<compile_context>
chip_gen: v6e
topology: v6e:2x2x1
jax: 0.10.0
libtpu: 0.0.40
codegen_flags: <defaults>
</compile_context>

<pallas_src>
import functools

import jax
import jax.numpy as jnp
from jax.experimental import pallas as pl
from jax.experimental.pallas import tpu as pltpu


def _round_up(a: int, m: int) -> int:
    return (a + m - 1) // m * m


# --------------------------------------------------------------------------
# Hardware-dependent deployment config (n_j / k_tile / VMEM limit).
# --------------------------------------------------------------------------
def choose_config(d_in: int):
    kind = ""
    try:
        kind = jax.devices()[0].device_kind.lower()
    except Exception:
        pass
    if "v7" in kind:
        # Two TensorCores, 64 MiB VMEM per core: split hidden dim, modest tile.
        n_j, k_tile, vmem = 2, 16384, 48 * 1024 * 1024
    else:
        # Single-TC v5e/v6e with 128 MiB VMEM: contiguous W1 rows, big K tile.
        n_j, k_tile, vmem = 1, 32768, 96 * 1024 * 1024
    k_tile = max(512, min(k_tile, _round_up(d_in, 512)))
    return n_j, k_tile, vmem


# --------------------------------------------------------------------------
# One-time weight preparation (hoisted OUT of the per-call jitted path).
# --------------------------------------------------------------------------
def prepare_params(w1, b1, w2, b2, w3, b3, *, k_tile: int, n_j: int):
    d_in, H = w1.shape
    OUT = w3.shape[1]
    assert H % n_j == 0 and (H // n_j) % 128 == 0, "hidden tile must be lane-aligned"
    h_tile = H // n_j

    d_pad = _round_up(d_in, k_tile)
    if d_pad != d_in:
        # Zero pad: padded K rows must stay zero so they contribute exactly 0.
        w1 = jnp.pad(w1, ((0, d_pad - d_in), (0, 0)))

    # bf16 + per-core-contiguous halves: (n_j, d_pad, h_tile).
    w1p = jnp.transpose(
        w1.astype(jnp.bfloat16).reshape(d_pad, n_j, h_tile), (1, 0, 2))

    params = (
        jax.block_until_ready(w1p),
        b1.reshape(1, H).astype(jnp.float32),
        w2.astype(jnp.float32),
        b2.reshape(1, H).astype(jnp.float32),
        w3.astype(jnp.float32),
        b3.reshape(1, OUT).astype(jnp.float32),
    )
    meta = dict(d_in=d_in, d_pad=d_pad, k_tile=k_tile, n_j=n_j,
                h=H, h_tile=h_tile, out=OUT)
    return params, meta


# --------------------------------------------------------------------------
# Fused kernel (n_j == 1): h1 = relu(x @ W1 + b1) accumulated over K tiles,
# head applied in the finalize step (W2/b2/W3/b3 are grid-invariant residents).
# --------------------------------------------------------------------------
def _fused_kernel(x_ref, w1_ref, b1_ref, w2_ref, b2_ref, w3_ref, b3_ref,
                  out_ref, acc_ref):
    k = pl.program_id(0)

    @pl.when(k == 0)
    def _init():
        acc_ref[...] = jnp.zeros_like(acc_ref)

    # bf16 x bf16 -> f32 accumulate on the MXU.
    acc_ref[...] += jnp.dot(x_ref[...], w1_ref[...],
                            preferred_element_type=jnp.float32)

    @pl.when(k == pl.num_programs(0) - 1)
    def _finalize():
        h1 = jnp.maximum(acc_ref[...] + b1_ref[...], 0.0)
        h2 = jnp.dot(h1, w2_ref[...], preferred_element_type=jnp.float32)
        h2 = jnp.maximum(h2 + b2_ref[...], 0.0)
        logits = jnp.dot(h2, w3_ref[...], preferred_element_type=jnp.float32)
        out_ref[...] = (logits + b3_ref[...]).astype(out_ref.dtype)


# --------------------------------------------------------------------------
# Split kernels (n_j > 1, v7x megacore): layer 1 per hidden half, tiny head.
# --------------------------------------------------------------------------
def _layer1_kernel(x_ref, w1_ref, b1_ref, h1_ref, acc_ref):
    k = pl.program_id(1)

    @pl.when(k == 0)
    def _init():
        acc_ref[...] = jnp.zeros_like(acc_ref)

    acc_ref[...] += jnp.dot(x_ref[...], w1_ref[...],
                            preferred_element_type=jnp.float32)

    @pl.when(k == pl.num_programs(1) - 1)
    def _finalize():
        h1_ref[...] = jnp.maximum(acc_ref[...] + b1_ref[...], 0.0)


def _head_kernel(h1_ref, w2_ref, b2_ref, w3_ref, b3_ref, out_ref):
    h2 = jnp.dot(h1_ref[...], w2_ref[...], preferred_element_type=jnp.float32)
    h2 = jnp.maximum(h2 + b2_ref[...], 0.0)
    logits = jnp.dot(h2, w3_ref[...], preferred_element_type=jnp.float32)
    out_ref[...] = (logits + b3_ref[...]).astype(out_ref.dtype)


# --------------------------------------------------------------------------
# Jitted forward: only x is padded / cast per call (cheap: x << W1).
# --------------------------------------------------------------------------
@functools.partial(
    jax.jit,
    static_argnames=("d_in", "d_pad", "k_tile", "n_j", "vmem_limit_bytes"))
def guansang_forward(x, w1p, b1r, w2, b2r, w3, b3r, *,
                     d_in, d_pad, k_tile, n_j, vmem_limit_bytes):
    B = x.shape[0]
    n_jj, _, h_tile = w1p.shape
    assert n_jj == n_j
    H = n_j * h_tile
    OUT = w3.shape[1]
    n_k = d_pad // k_tile

    if d_pad != d_in:
        x = jnp.pad(x, ((0, 0), (0, d_pad - d_in)))
    xc = x.astype(jnp.bfloat16)

    if n_j == 1:
        # Single pallas_call: layer 1 K-accumulation + fused head.
        cost = pl.CostEstimate(
            flops=2 * B * (d_pad * H + H * H + H * OUT),
            transcendentals=0,
            bytes_accessed=(d_pad * H * 2          # W1 (bf16) stream — dominant
                            + B * d_pad * 2        # x (bf16)
                            + H * H * 4 + H * OUT * 4
                            + (2 * H + OUT) * 4
                            + B * OUT * 4))
        grid_spec = pltpu.PrefetchScalarGridSpec(
            num_scalar_prefetch=0,
            grid=(n_k,),                                           # K reduction
            in_specs=[
                pl.BlockSpec((B, k_tile), lambda k: (0, k)),                  # x
                pl.BlockSpec((pl.Squeezed(), k_tile, H), lambda k: (0, k, 0)),  # W1
                pl.BlockSpec((1, H), lambda k: (0, 0)),                       # b1
                pl.BlockSpec((H, H), lambda k: (0, 0)),                       # W2
                pl.BlockSpec((1, H), lambda k: (0, 0)),                       # b2
                pl.BlockSpec((H, OUT), lambda k: (0, 0)),                     # W3
                pl.BlockSpec((1, OUT), lambda k: (0, 0)),                     # b3
            ],
            out_specs=pl.BlockSpec((B, OUT), lambda k: (0, 0)),
            scratch_shapes=[pltpu.VMEM((B, H), jnp.float32)],
        )
        return pl.pallas_call(
            _fused_kernel,
            out_shape=jax.ShapeDtypeStruct((B, OUT), jnp.float32),
            grid_spec=grid_spec,
            compiler_params=pltpu.CompilerParams(
                dimension_semantics=("arbitrary",),
                vmem_limit_bytes=vmem_limit_bytes),
            cost_estimate=cost,
        )(xc, w1p, b1r, w2, b2r, w3, b3r)

    # n_j > 1 (v7x): split the hidden dim across TensorCores, then a tiny head.
    layer1_cost = pl.CostEstimate(
        flops=2 * B * d_pad * H,
        transcendentals=0,
        bytes_accessed=(d_pad * H * 2 + B * d_pad * 2 + H * 4 + B * H * 4))

    grid_spec = pltpu.PrefetchScalarGridSpec(
        num_scalar_prefetch=0,
        grid=(n_j, n_k),                                    # reduction axis last
        in_specs=[
            pl.BlockSpec((B, k_tile), lambda j, k: (0, k)),                   # x
            pl.BlockSpec((pl.Squeezed(), k_tile, h_tile),
                         lambda j, k: (j, k, 0)),                             # W1 (per-core half)
            pl.BlockSpec((1, h_tile), lambda j, k: (0, j)),                   # b1
        ],
        out_specs=pl.BlockSpec((B, h_tile), lambda j, k: (0, j)),
        scratch_shapes=[pltpu.VMEM((B, h_tile), jnp.float32)],
    )
    h1 = pl.pallas_call(
        _layer1_kernel,
        out_shape=jax.ShapeDtypeStruct((B, H), jnp.float32),
        grid_spec=grid_spec,
        compiler_params=pltpu.CompilerParams(
            dimension_semantics=("parallel", "arbitrary"),
            vmem_limit_bytes=vmem_limit_bytes),
        cost_estimate=layer1_cost,
    )(xc, w1p, b1r)

    # Tiny head: everything resident, single invocation (no grid).
    return pl.pallas_call(
        _head_kernel,
        out_shape=jax.ShapeDtypeStruct((B, OUT), jnp.float32),
    )(h1, w2, b2r, w3, b3r)


# --------------------------------------------------------------------------
# Init / reference.
# --------------------------------------------------------------------------
def init_params(key, d_in, hidden, d_out):
    """Deterministic init matching nn.Linear defaults: U(-1/sqrt(fan_in), +)."""
    ks = jax.random.split(key, 6)

    def linear(kw, kb, fan_in, fan_out):
        bound = 1.0 / jnp.sqrt(jnp.float32(fan_in))
        w = jax.random.uniform(kw, (fan_in, fan_out), jnp.float32, -bound, bound)
        b = jax.random.uniform(kb, (fan_out,), jnp.float32, -bound, bound)
        return w, b

    w1, b1 = linear(ks[0], ks[1], d_in, hidden)
    w2, b2 = linear(ks[2], ks[3], hidden, hidden)
    w3, b3 = linear(ks[4], ks[5], hidden, d_out)
    return w1, b1, w2, b2, w3, b3


def reference_forward(x, w1, b1, w2, b2, w3, b3):
    """Reference with the same bf16 rounding of x/W1 the kernel applies."""
    xq = x.astype(jnp.bfloat16).astype(jnp.float32)
    w1q = w1.astype(jnp.bfloat16).astype(jnp.float32)
    hp = jax.lax.Precision.HIGHEST
    h1 = jnp.maximum(jnp.dot(xq, w1q, precision=hp) + b1, 0.0)
    h2 = jnp.maximum(jnp.dot(h1, w2, precision=hp) + b2, 0.0)
    return jnp.dot(h2, w3, precision=hp) + b3


if __name__ == "__main__":
    # Small stand-in for the 478x478 grayscale image: 30x30 -> D_IN = 900.
    # 900 is deliberately not a multiple of the K tile, exercising the same
    # zero-padding path the real 478*478 = 228,484 input needs.
    B, IMG, HIDDEN, OUT = 8, 30, 512, 5
    D_IN = IMG * IMG

    key = jax.random.PRNGKey(0)
    k_x, k_p = jax.random.split(key)

    # NCHW-style image input (B, 1, H, W), flattened in plain JAX (glue),
    # exactly like nn.Flatten().
    img = jax.random.normal(k_x, (B, 1, IMG, IMG), jnp.float32)
    x = img.reshape(B, D_IN)

    w1, b1, w2, b2, w3, b3 = init_params(k_p, D_IN, HIDDEN, OUT)
    ref = reference_forward(x, w1, b1, w2, b2, w3, b3)

    # Exercise both code paths with small K tiles (D_IN=900 -> padded 1024,
    # n_k=2: multi-step accumulation + padding), plus the auto-selected
    # deployment config for whatever chip this runs on.
    n_j_auto, k_tile_auto, vmem_auto = choose_config(D_IN)
    configs = [
        dict(n_j=1, k_tile=512, vmem=48 * 1024 * 1024),   # fused single-TC path
        dict(n_j=2, k_tile=512, vmem=48 * 1024 * 1024),   # v7x hidden-split path
        dict(n_j=n_j_auto, k_tile=k_tile_auto, vmem=vmem_auto),
    ]

    for cfg in configs:
        # One-time weight prep (outside the jitted per-call path).
        params, meta = prepare_params(w1, b1, w2, b2, w3, b3,
                                      k_tile=cfg["k_tile"], n_j=cfg["n_j"])
        logits = guansang_forward(
            x, *params,
            d_in=D_IN, d_pad=meta["d_pad"], k_tile=cfg["k_tile"],
            n_j=cfg["n_j"], vmem_limit_bytes=cfg["vmem"])
        logits = jax.block_until_ready(logits)
        assert logits.shape == (B, OUT)
        assert jnp.allclose(logits, ref, atol=2e-3, rtol=2e-3), \
            f"mismatch vs reference for config {cfg}"

    print("KERNEL_OK")
</pallas_src>

<mosaic_0001>
module attributes {stable_mosaic.version = 11 : i64} {
  func.func @_fused_kernel(%arg0: i32, %arg1: memref<8x512xbf16, #tpu.memory_space<vmem>>, %arg2: memref<1x512x512xbf16, #tpu.memory_space<vmem>>, %arg3: memref<1x512xf32, #tpu.memory_space<vmem>>, %arg4: memref<512x512xf32, #tpu.memory_space<vmem>>, %arg5: memref<1x512xf32, #tpu.memory_space<vmem>>, %arg6: memref<512x5xf32, #tpu.memory_space<vmem>>, %arg7: memref<1x5xf32, #tpu.memory_space<vmem>>, %arg8: memref<8x5xf32, #tpu.memory_space<vmem>>, %arg9: memref<8x512xf32, #tpu.memory_space<vmem>>) attributes {dimension_semantics = [#tpu.dimension_semantics<arbitrary>], iteration_bounds = array<i64: 2>, scalar_prefetch = 0 : i64, scratch_operands = 1 : i64, tpu.core_type = #tpu.core_type<tc>, window_params = [{transform_indices = @transform_0, window_bounds = array<i64: 8, 512>}, {transform_indices = @transform_1, window_bounds = array<i64: 1, 512, 512>}, {pipeline_mode = #tpu.pipeline_mode<synchronous>, transform_indices = @transform_2, window_bounds = array<i64: 1, 512>}, {pipeline_mode = #tpu.pipeline_mode<synchronous>, transform_indices = @transform_3, window_bounds = array<i64: 512, 512>}, {pipeline_mode = #tpu.pipeline_mode<synchronous>, transform_indices = @transform_4, window_bounds = array<i64: 1, 512>}, {pipeline_mode = #tpu.pipeline_mode<synchronous>, transform_indices = @transform_5, window_bounds = array<i64: 512, 5>}, {pipeline_mode = #tpu.pipeline_mode<synchronous>, transform_indices = @transform_6, window_bounds = array<i64: 1, 5>}, {pipeline_mode = #tpu.pipeline_mode<synchronous>, transform_indices = @transform_7, window_bounds = array<i64: 8, 5>}]} {
    %c0_i32 = arith.constant 0 : i32
    %0 = arith.cmpi eq, %arg0, %c0_i32 : i32
    %1 = arith.extui %0 : i1 to i32
    %c0_i32_0 = arith.constant 0 : i32
    %2 = arith.cmpi ne, %1, %c0_i32_0 : i32
    scf.if %2 {
      %cst_10 = arith.constant 0.000000e+00 : f32
      %13 = vector.broadcast %cst_10 : f32 to vector<8x512xf32>
      %c0_11 = arith.constant 0 : index
      %c0_12 = arith.constant 0 : index
      %14 = vector.load %arg9[%c0_11, %c0_12] : memref<8x512xf32, #tpu.memory_space<vmem>>, vector<8x512xf32>
      tpu.vector_store %arg9[%c0_11, %c0_12], %13 {strides = array<i32>} : memref<8x512xf32, #tpu.memory_space<vmem>>, vector<8x512xf32>,
    } else {
    }
    %c0 = arith.constant 0 : index
    %c0_1 = arith.constant 0 : index
    %3 = vector.load %arg9[%c0, %c0_1] : memref<8x512xf32, #tpu.memory_space<vmem>>, vector<8x512xf32>
    %c0_2 = arith.constant 0 : index
    %c0_3 = arith.constant 0 : index
    %4 = vector.load %arg1[%c0_2, %c0_3] : memref<8x512xbf16, #tpu.memory_space<vmem>>, vector<8x512xbf16>
    %c0_4 = arith.constant 0 : index
    %c0_5 = arith.constant 0 : index
    %c0_6 = arith.constant 0 : index
    %5 = vector.load %arg2[%c0_4, %c0_5, %c0_6] : memref<1x512x512xbf16, #tpu.memory_space<vmem>>, vector<1x512x512xbf16>
    %6 = vector.shape_cast %5 : vector<1x512x512xbf16> to vector<512x512xbf16>
    %cst = arith.constant dense<0.000000e+00> : vector<8x512xf32>
    %7 = tpu.matmul %4, %6, %cst {dimension_numbers = #tpu.dot_dimension_numbers<[1], [0], [0], [1], [0, 0, 1, 1], [], []>} : vector<8x512xbf16>, vector<512x512xbf16>, vector<8x512xf32> -> vector<8x512xf32>
    %8 = arith.addf %3, %7 : vector<8x512xf32>
    %c0_7 = arith.constant 0 : index
    %c0_8 = arith.constant 0 : index
    %9 = vector.load %arg9[%c0_7, %c0_8] : memref<8x512xf32, #tpu.memory_space<vmem>>, vector<8x512xf32>
    tpu.vector_store %arg9[%c0_7, %c0_8], %8 {strides = array<i32>} : memref<8x512xf32, #tpu.memory_space<vmem>>, vector<8x512xf32>,
    %c1_i32 = arith.constant 1 : i32
    %10 = arith.cmpi eq, %arg0, %c1_i32 : i32
    %11 = arith.extui %10 : i1 to i32
    %c0_i32_9 = arith.constant 0 : i32
    %12 = arith.cmpi ne, %11, %c0_i32_9 : i32
    scf.if %12 {
      %c0_10 = arith.constant 0 : index
      %c0_11 = arith.constant 0 : index
      %13 = vector.load %arg9[%c0_10, %c0_11] : memref<8x512xf32, #tpu.memory_space<vmem>>, vector<8x512xf32>
      %c0_12 = arith.constant 0 : index
      %c0_13 = arith.constant 0 : index
      %14 = vector.load %arg3[%c0_12, %c0_13] : memref<1x512xf32, #tpu.memory_space<vmem>>, vector<1x512xf32>
      %15 = vector.broadcast %14 : vector<1x512xf32> to vector<8x512xf32>
      %16 = arith.addf %13, %15 : vector<8x512xf32>
      %cst_14 = arith.constant 0.000000e+00 : f32
      %17 = vector.broadcast %cst_14 : f32 to vector<8x512xf32>
      %18 = arith.maximumf %16, %17 : vector<8x512xf32>
      %c0_15 = arith.constant 0 : index
      %c0_16 = arith.constant 0 : index
      %19 = vector.load %arg4[%c0_15, %c0_16] : memref<512x512xf32, #tpu.memory_space<vmem>>, vector<512x512xf32>
      %cst_17 = arith.constant dense<0.000000e+00> : vector<8x512xf32>
      %20 = tpu.matmul %18, %19, %cst_17 {dimension_numbers = #tpu.dot_dimension_numbers<[1], [0], [0], [1], [0, 0, 1, 1], [], []>} : vector<8x512xf32>, vector<512x512xf32>, vector<8x512xf32> -> vector<8x512xf32>
      %c0_18 = arith.constant 0 : index
      %c0_19 = arith.constant 0 : index
      %21 = vector.load %arg5[%c0_18, %c0_19] : memref<1x512xf32, #tpu.memory_space<vmem>>, vector<1x512xf32>
      %22 = vector.broadcast %21 : vector<1x512xf32> to vector<8x512xf32>
      %23 = arith.addf %20, %22 : vector<8x512xf32>
      %cst_20 = arith.constant 0.000000e+00 : f32
      %24 = vector.broadcast %cst_20 : f32 to vector<8x512xf32>
      %25 = arith.maximumf %23, %24 : vector<8x512xf32>
      %c0_21 = arith.constant 0 : index
      %c0_22 = arith.constant 0 : index
      %26 = vector.load %arg6[%c0_21, %c0_22] : memref<512x5xf32, #tpu.memory_space<vmem>>, vector<512x5xf32>
      %cst_23 = arith.constant dense<0.000000e+00> : vector<8x5xf32>
      %27 = tpu.matmul %25, %26, %cst_23 {dimension_numbers = #tpu.dot_dimension_numbers<[1], [0], [0], [1], [0, 0, 1, 1], [], []>} : vector<8x512xf32>, vector<512x5xf32>, vector<8x5xf32> -> vector<8x5xf32>
      %c0_24 = arith.constant 0 : index
      %c0_25 = arith.constant 0 : index
      %28 = vector.load %arg7[%c0_24, %c0_25] : memref<1x5xf32, #tpu.memory_space<vmem>>, vector<1x5xf32>
      %29 = vector.broadcast %28 : vector<1x5xf32> to vector<8x5xf32>
      %30 = arith.addf %27, %29 : vector<8x5xf32>
      %c0_26 = arith.constant 0 : index
      %c0_27 = arith.constant 0 : index
      %31 = vector.load %arg8[%c0_26, %c0_27] : memref<8x5xf32, #tpu.memory_space<vmem>>, vector<8x5xf32>
      tpu.vector_store %arg8[%c0_26, %c0_27], %30 {strides = array<i32>} : memref<8x5xf32, #tpu.memory_space<vmem>>, vector<8x5xf32>,
    } else {
    }
    return
  }
  func.func @transform_0(%arg0: i32) -> (i32, i32) {
    %c0_i32 = arith.constant 0 : i32
    %c0_i32_0 = arith.constant 0 : i32
    return %c0_i32, %arg0 : i32, i32
  }
  func.func @transform_1(%arg0: i32) -> (i32, i32, i32) {
    %c0_i32 = arith.constant 0 : i32
    %c0_i32_0 = arith.constant 0 : i32
    %c0_i32_1 = arith.constant 0 : i32
    return %c0_i32, %arg0, %c0_i32_0 : i32, i32, i32
  }
  func.func @transform_2(%arg0: i32) -> (i32, i32) {
    %c0_i32 = arith.constant 0 : i32
    %c0_i32_0 = arith.constant 0 : i32
    %c0_i32_1 = arith.constant 0 : i32
    return %c0_i32, %c0_i32_0 : i32, i32
  }
  func.func @transform_3(%arg0: i32) -> (i32, i32) {
    %c0_i32 = arith.constant 0 : i32
    %c0_i32_0 = arith.constant 0 : i32
    %c0_i32_1 = arith.constant 0 : i32
    return %c0_i32, %c0_i32_0 : i32, i32
  }
  func.func @transform_4(%arg0: i32) -> (i32, i32) {
    %c0_i32 = arith.constant 0 : i32
    %c0_i32_0 = arith.constant 0 : i32
    %c0_i32_1 = arith.constant 0 : i32
    return %c0_i32, %c0_i32_0 : i32, i32
  }
  func.func @transform_5(%arg0: i32) -> (i32, i32) {
    %c0_i32 = arith.constant 0 : i32
    %c0_i32_0 = arith.constant 0 : i32
    %c0_i32_1 = arith.constant 0 : i32
    return %c0_i32, %c0_i32_0 : i32, i32
  }
  func.func @transform_6(%arg0: i32) -> (i32, i32) {
    %c0_i32 = arith.constant 0 : i32
    %c0_i32_0 = arith.constant 0 : i32
    %c0_i32_1 = arith.constant 0 : i32
    return %c0_i32, %c0_i32_0 : i32, i32
  }
  func.func @transform_7(%arg0: i32) -> (i32, i32) {
    %c0_i32 = arith.constant 0 : i32
    %c0_i32_0 = arith.constant 0 : i32
    %c0_i32_1 = arith.constant 0 : i32
    return %c0_i32, %c0_i32_0 : i32, i32
  }
}

</mosaic_0001>

<bundles_post_ra>
// kernel: guansang_forward.1
= control target key start
LH: loop header
LB: loop body
LE: loop exit
PB: predicated region body
PF: predicated region fallthrough
CT: control target
= control target key end

     0   :  { %12 = vsyncpa [#allocation4], 0  ;;  %s3378_s0 = inlined_call_operand.vmem [shape: bf16[8,1024], index: 0, kind: input, shape index: {}]   ;;  %s3379_s1 = inlined_call_operand.hbm [shape: bf16[1,1024,512], index: 1, kind: input, shape index: {}]   ;;  %s3380_s2 = inlined_call_operand.vmem [shape: f32[1,512], index: 2, kind: input, shape index: {}]   ;;  %s3381_s3 = inlined_call_operand.hbm [shape: f32[512,512], index: 3, kind: input, shape index: {}]   ;;  %s3382_s4 = inlined_call_operand.vmem [shape: f32[1,512], index: 4, kind: input, shape index: {}]   ;;  %s3383_s5 = inlined_call_operand.vmem [shape: f32[512,5], index: 5, kind: input, shape index: {}]   ;;  %s3384_s6 = inlined_call_operand.vmem [shape: f32[1,5], index: 6, kind: input, shape index: {}]   ;;  %s3385_s7 = inlined_call_operand.hbm [shape: f32[8,5], index: 7, kind: output, shape index: {}]  }
   0x1   :  { %14 = vsyncpa [#allocation4 + $0x1], 0 }
   0x2   :  { %15 = vsyncpa [#allocation7], 0 }
   0x3   :  { %16 = vsyncpa [#allocation5], 0  ;;  %s2840_s24 = smov 0   ;;  %s2842_s25 = smov 0  }
   0x4   :  { %s2844_s26 = smov 0   ;;  %s2846_s27 = smov 0  }
   0x5 LB: > { %s2859_s28 = sadd.s32 4294967295, %s2790_s27   ;;  %p68_p0 = scmp.ne.s32.totalorder %s2782_s25, %s2778_s24  ;;  %s2790_s27 = sphi %s2846_s27, %s3401_s27   ;;  %s2786_s26 = sphi %s2844_s26, %s3400_s26   ;;  %s2782_s25 = sphi %s2842_s25, %s3399_s25   ;;  %s2778_s24 = sphi %s2840_s24, %s3398_s24  }
   0x6   : > { %p3386_p1 = scmp.eq.s32.totalorder %s2859_s28, 0  ;;  %p2189_p2 = scmp.ge.s32.totalorder %s2790_s27, 1 }
   0x7   : > { %p205_p3 = scmp.lt.s32.totalorder %s2790_s27, 3  ;;  %s2792_s8 = smov [#allocation6]  }
   0x8   : > { %p2868_p5 = por %p3386_p1, %p68_p0  ;;  %s220_s9 = sshll.u32 %s2792_s8, 4  ;;  %s221_s9 = int_to_ptr.vmem [resolvable:$true] %s220_s9 }
   0x9   : > { %p2872_p6 = pnand %p2189_p2, %p205_p3  ;;  %s2885_s11 = sadd.s32 1, %s2790_s27  }
   0xa   : > { %s3389_s29 = scalar_select %p2868_p5, 1, 0 }
   0xb   : > { %s3390_s30 = scalar_select %p2872_p6, 1, 0 }
   0xc   : > { %p2422_p7 = pneg %p2872_p6  ;;  %s55_s12 = sadd.s32 1, %s2786_s26 }
   0xd   : > { %s52_s13 = ssub.s32 %s2790_s27, %s2885_s11  ;;  %s2681_s14 = scalar_lea.vmem %s221_s9, 32768 }
   0xe   : > { %p2880_p8 = pnand %p2422_p7, %p3386_p1  ;;  %p2682_p10 = scmp.ne.s32.totalorder %s221_s9, %s2681_s14 }
   0xf   : > { %p2689_p13 = scmp.lt.s32.totalorder %s221_s9, %s221_s9  ;;  %p2690_p0 = scmp.lt.s32.totalorder %s2681_s14, %s2681_s14 }
  0x10   : > { %p2672_p9 = pneg %p2880_p8 }
  0x11   : > { %p2691_p2 = por %p2690_p0, %p2689_p13 }
  0x12   : > { %p2684_p11 = pnand %p2682_p10, %p2672_p9 }
  0x14   : > { %p2685_p12 = pneg %p2684_p11 }
  0x16   : > { %p2692_p3 = pnand %p2691_p2, %p2685_p12 }
  0x18   : > { %2695 = shalt.err (!%p2692_p3)
}
  0x19   : > { %s2793_s15 = smov 512   ;;  %s2794_s16 = smov 32  }
  0x1a   : > { %2425 = dma.hbm_to_vmem [thread:$0]  (!%p2880_p8), %s3381_s3, 32768, %s221_s9, [#allocation7], %s2793_s15, %s2793_s15, %s2794_s16  }
  0x1b   : > { %p53_p7 = scmp.eq.s32.totalorder %s52_s13, 0  ;;  %p62_p9 = scmp.ne.s32.totalorder %s2786_s26, %s2782_s25 }
  0x1c   : > { %p63_p10 = scmp.eq.s32.totalorder %s2790_s27, 0  ;;  %p2431_p11 = scmp.lt.s32.totalorder %s2790_s27, 2 }
  0x1d   : > { %s2902_s19 = scalar_select %p53_p7, %s2786_s26, %s55_s12  }
  0x1e   : > { %p64_p12 = por %p63_p10, %p62_p9  ;;  %s252_s20 = sand.u32 1, %s2786_s26  }
  0x1f   : > { %s2192_s21 = sshll.u32 %s252_s20, 10  ;;  %s2341_s22 = sshll.u32 %s2790_s27, 14 }
  0x20   : > { %s2909_s8 = scalar_lea.hbm %s3379_s1, %s2341_s22  ;;  %s256_s10 = scalar_lea.vmem [#allocation3], %s2192_s21 }
  0x21   : > { %s264_s9 = sshll.u32 %s256_s10, 4  ;;  %p2913_p8 = pnand %p2431_p11, %p64_p12  ;;  %s2911_s9 = int_to_ptr.vmem [resolvable:$true] %s264_s9 }
  0x22   : > { %s2917_s12 = scalar_lea.sflag [#allocation4], %s252_s20  ;;  %s2696_s27 = scalar_lea.hbm %s2909_s8, 16384 }
  0x23   : > { %p2697_p13 = scmp.ne.s32.totalorder %s2909_s8, %s2696_s27  ;;  %p2698_p0 = pneg %p2913_p8 }
  0x24   : > { %s2701_s16 = scalar_lea.hbm %s3379_s1, 32768  ;;  %p2702_p7 = scmp.lt.s32.totalorder %s2909_s8, %s3379_s1 }
  0x25   : > { %p2699_p2 = pnand %p2698_p0, %p2697_p13  ;;  %p2703_p9 = scmp.lt.s32.totalorder %s2701_s16, %s2696_s27 }
  0x27   : > { %p2700_p3 = pneg %p2699_p2  ;;  %p2704_p10 = por %p2703_p9, %p2702_p7 }
  0x29   : > { %p2705_p11 = pnand %p2704_p10, %p2700_p3 }
  0x2b   : > { %2708 = shalt.err (!%p2705_p11)
}
  0x2c   : > { %s2709_s20 = scalar_lea.vmem %s2911_s9, 16384  ;;  %s2795_s21 = smov [#allocation3]  }
  0x2d   : > { %p2710_p12 = scmp.ne.s32.totalorder %s2911_s9, %s2709_s20  ;;  %s2714_s22 = sshll.u32 %s2795_s21, 4  ;;  %s2715_s22 = int_to_ptr.vmem [resolvable:$false] %s2714_s22 }
  0x2e   : > { %s2716_s23 = scalar_lea.vmem %s2715_s22, 32768  ;;  %p2717_p2 = scmp.lt.s32.totalorder %s2911_s9, %s2715_s22 }
  0x2f   : > { %p2712_p4 = pnand %p2710_p12, %p2698_p0  ;;  %p2718_p1 = scmp.lt.s32.totalorder %s2716_s23, %s2709_s20 }
  0x31   : > { %p2713_p13 = pneg %p2712_p4  ;;  %p2719_p5 = por %p2718_p1, %p2717_p2 }
  0x33   : > { %p2720_p6 = pnand %p2719_p5, %p2713_p13 }
  0x35   : > { %2723 = shalt.err (!%p2720_p6)
}
  0x36   : > { %s2796_s24 = smov 256   ;;  %s2797_s10 = smov 16  }
  0x37   : > { %2429 = dma.hbm_to_vmem [thread:$0]  (!%p2913_p8), %s2909_s8, 16384, %s2911_s9, %s2917_s12, %s2796_s24, %s2796_s24, %s2797_s10  }
  0x38   : > { %p3393_p0 = scmp.ne.s32.totalorder %s3390_s30, 0 }
  0x39   : > { %s278_s27 = sand.u32 (!%p3393_p0), 1, %s2782_s25   ;;  %p3394_p1 = scmp.ne.s32.totalorder (!%p3393_p0), %s3389_s29, 0 }
  0x3a   : > { %276 = sbr.rel (%p3393_p0) target bundleno = 957 (0x3bd), region = 48  ;;  %s2197_s14 = sshll.u32 (!%p3393_p0), %s278_s27, 10 }
  0x3b   : > { %s279_s15 = scalar_lea.sflag (!%p3393_p0), [#allocation4], %s278_s27  ;;  %s2941_s16 = scalar_lea.vmem (!%p3393_p0), [#allocation3], %s2197_s14 }
  0x3f   : > { %2765 = dma.done.wait (%p3394_p1), %s279_s15, 16384  }
  0x40   : > { %2767 = vsyncadd (%p3394_p1), %s279_s15, 4294950912  ;;  %p3395_p4 = scmp.eq.s32.totalorder %s2859_s28, 0 }
  0x42   : > { %2769 = dma.done.wait (%p3395_p4), [#allocation7], 32768   ;;  %p3396_p5 = pmov %p3395_p4 }
  0x43   : > { %s2199_s30 = sshll.u32 %s2859_s28, 2  ;;  %p3397_p8 = scmp.ne.s32.totalorder %s2859_s28, 0 }
  0x44   : > { %2771 = vsyncadd (%p3396_p5), [#allocation7], 4294934528  ;;  %p318_p6 = scmp.lt.s32.totalorder %s2199_s30, 7 }
  0x45   : > { %327 = sbr.rel (%p3397_p8) target bundleno = 77 (0x4d), region = 60 }
  0x46   : > { %s3403_s30 = smov (!%p318_p6, %s2199_s30), 7 }
  0x47   : > { %s2200_s8 = sshll.u32 %s3403_s30, 2 }
  0x48   : > { %s2955_s12 = scalar_lea.vmem %s3378_s0, %s2200_s8 }
  0x4a   : > { %v2798_v0 = vmov 0.0  }
  0x4b   : > { %328 = vst [vmem:[#allocation2 + $0x10] sm:$0xff] %v2798_v0  ;;  %329 = vst [vmem:[#allocation2] sm:$0xff] %v2798_v0 }
  0x4c   : > { %330 = vst [vmem:[#allocation2 + $0x18] sm:$0xff] %v2798_v0  ;;  %331 = vst [vmem:[#allocation2 + $0x8] sm:$0xff] %v2798_v0 }
  0x4d PF: > { %v2474_v1 = vld [vmem:[%s2941_s16 + $0xe4] ss:$16 sps:$4 sm:$0xff]   ;;  %v2478_v3 = vld [vmem:[%s2941_s16 + $0xe0] ss:$16 sps:$4 sm:$0xff]   ;;  %v337_v49 = vld [vmem:[%s2955_s12 + $0x8] sm:$0xff]  ;;  %p2334_p3 = scmp.ne.s32.totalorder %s2859_s28, 1 }
  0x4e   : > { %v2476_v2 = vld [vmem:[%s2941_s16 + $0x2e4] ss:$16 sps:$4 sm:$0xff]   ;;  %1120 = vmatprep.subr.bf16.mxu0 %v2474_v1  ;;  %v2479_v4 = vld [vmem:[%s2941_s16 + $0x2e0] ss:$16 sps:$4 sm:$0xff]   ;;  %v2205_v52 = vcombine.high %v337_v49, %v337_v49 }
  0x4f   : > { %1161 = vmatprep.subr.bf16.mxu1 %v2476_v2  ;;  %v2480_v5 = vld [vmem:[%s2941_s16 + $0xc4] ss:$16 sps:$4 sm:$0xff]   ;;  %1121 = vmatpush1.bf16.msra.mxu0 %v2478_v3  ;;  %v2484_v7 = vld [vmem:[%s2941_s16 + $0xc0] ss:$16 sps:$4 sm:$0xff]  }
  0x50   : > { %1162 = vmatpush1.bf16.msra.mxu1 %v2479_v4  ;;  %v2482_v6 = vld [vmem:[%s2941_s16 + $0x2c4] ss:$16 sps:$4 sm:$0xff]   ;;  %1122 = vmatprep.subr.bf16.mxu0 %v2480_v5  ;;  %v2485_v8 = vld [vmem:[%s2941_s16 + $0x2c0] ss:$16 sps:$4 sm:$0xff]   ;;  %v2576_v5 = vld [vmem:[%s2941_s16 + $0xec] ss:$16 sps:$4 sm:$0xff]  }
  0x51   : > { %1163 = vmatprep.subr.bf16.mxu1 %v2482_v6  ;;  %v2486_v9 = vld [vmem:[%s2941_s16 + $0xa4] ss:$16 sps:$4 sm:$0xff]   ;;  %v2490_v11 = vld [vmem:[%s2941_s16 + $0xa0] ss:$16 sps:$4 sm:$0xff]   ;;  %1193 = vmatprep.mubr.bf16.mxu1 %v2205_v52  ;;  %v2579_v6 = vld [vmem:[%s2941_s16 + $0x2ec] ss:$16 sps:$4 sm:$0xff]  }
  0x52   : > { %v2488_v10 = vld [vmem:[%s2941_s16 + $0x2a4] ss:$16 sps:$4 sm:$0xff]   ;;  %v2491_v12 = vld [vmem:[%s2941_s16 + $0x2a0] ss:$16 sps:$4 sm:$0xff]  }
  0x53   : > { %1123 = vmatpush1.bf16.msra.mxu0 %v2484_v7  ;;  %v2492_v13 = vld [vmem:[%s2941_s16 + $0x84] ss:$16 sps:$4 sm:$0xff]   ;;  %v2496_v15 = vld [vmem:[%s2941_s16 + $0x80] ss:$16 sps:$4 sm:$0xff]  }
  0x54   : > { %1164 = vmatpush1.bf16.msra.mxu1 %v2485_v8  ;;  %1124 = vmatprep.subr.bf16.mxu0 %v2486_v9  ;;  %v2494_v14 = vld [vmem:[%s2941_s16 + $0x284] ss:$16 sps:$4 sm:$0xff]   ;;  %v2497_v16 = vld [vmem:[%s2941_s16 + $0x280] ss:$16 sps:$4 sm:$0xff]   ;;  %v3032_v8 = vcombine.low %v337_v49, %v337_v49  ;;  %v2574_v9 = vld [vmem:[%s2941_s16 + $0xe8] ss:$16 sps:$4 sm:$0xff]  }
  0x55   : > { %1165 = vmatprep.subr.bf16.mxu1 %v2488_v10  ;;  %v2498_v17 = vld [vmem:[%s2941_s16 + $0x64] ss:$16 sps:$4 sm:$0xff]   ;;  %v2502_v19 = vld [vmem:[%s2941_s16 + $0x60] ss:$16 sps:$4 sm:$0xff]   ;;  %v2577_v10 = vld [vmem:[%s2941_s16 + $0x2e8] ss:$16 sps:$4 sm:$0xff]  }
  0x56   : > { %v2500_v18 = vld [vmem:[%s2941_s16 + $0x264] ss:$16 sps:$4 sm:$0xff]   ;;  %v2503_v20 = vld [vmem:[%s2941_s16 + $0x260] ss:$16 sps:$4 sm:$0xff]   ;;  %v2634_v49 = vld [vmem:[%s2941_s16 + $0x1a8] ss:$16 sps:$4 sm:$0xff]  }
  0x57   : > { %1125 = vmatpush1.bf16.msra.mxu0 %v2490_v11  ;;  %v2504_v21 = vld [vmem:[%s2941_s16 + $0x44] ss:$16 sps:$4 sm:$0xff]   ;;  %v2508_v23 = vld [vmem:[%s2941_s16 + $0x40] ss:$16 sps:$4 sm:$0xff]   ;;  %v2582_v11 = vld [vmem:[%s2941_s16 + $0xcc] ss:$16 sps:$4 sm:$0xff]  }
  0x58   : > { %1166 = vmatpush1.bf16.msra.mxu1 %v2491_v12  ;;  %1126 = vmatprep.subr.bf16.mxu0 %v2492_v13  ;;  %v2506_v22 = vld [vmem:[%s2941_s16 + $0x244] ss:$16 sps:$4 sm:$0xff]   ;;  %v2509_v24 = vld [vmem:[%s2941_s16 + $0x240] ss:$16 sps:$4 sm:$0xff]   ;;  %v2585_v12 = vld [vmem:[%s2941_s16 + $0x2cc] ss:$16 sps:$4 sm:$0xff]  }
  0x59   : > { %1167 = vmatprep.subr.bf16.mxu1 %v2494_v14  ;;  %v2510_v25 = vld [vmem:[%s2941_s16 + $0x24] ss:$16 sps:$4 sm:$0xff]   ;;  %v2514_v27 = vld [vmem:[%s2941_s16 + $0x20] ss:$16 sps:$4 sm:$0xff]   ;;  %v2580_v13 = vld [vmem:[%s2941_s16 + $0xc8] ss:$16 sps:$4 sm:$0xff]  }
  0x5a   : > { %v2512_v26 = vld [vmem:[%s2941_s16 + $0x224] ss:$16 sps:$4 sm:$0xff]   ;;  %v2515_v28 = vld [vmem:[%s2941_s16 + $0x220] ss:$16 sps:$4 sm:$0xff]   ;;  %v2583_v14 = vld [vmem:[%s2941_s16 + $0x2c8] ss:$16 sps:$4 sm:$0xff]  }
  0x5b   : > { %1127 = vmatpush1.bf16.msra.mxu0 %v2496_v15  ;;  %v2516_v29 = vld [vmem:[%s2941_s16 + $0x4] ss:$16 sps:$4 sm:$0xff]   ;;  %v2520_v31 = vld [vmem:[%s2941_s16] ss:$16 sps:$4 sm:$0xff]   ;;  %v2588_v15 = vld [vmem:[%s2941_s16 + $0xac] ss:$16 sps:$4 sm:$0xff]  }
  0x5c   : > { %1168 = vmatpush1.bf16.msra.mxu1 %v2497_v16  ;;  %1128 = vmatprep.subr.bf16.mxu0 %v2498_v17  ;;  %v2518_v30 = vld [vmem:[%s2941_s16 + $0x204] ss:$16 sps:$4 sm:$0xff]   ;;  %v2521_v32 = vld [vmem:[%s2941_s16 + $0x200] ss:$16 sps:$4 sm:$0xff]   ;;  %v2591_v16 = vld [vmem:[%s2941_s16 + $0x2ac] ss:$16 sps:$4 sm:$0xff]  }
  0x5d   : > { %1169 = vmatprep.subr.bf16.mxu1 %v2500_v18  ;;  %v2522_v33 = vld [vmem:[%s2941_s16 + $0x1e4] ss:$16 sps:$4 sm:$0xff]   ;;  %v2526_v35 = vld [vmem:[%s2941_s16 + $0x1e0] ss:$16 sps:$4 sm:$0xff]   ;;  %v2586_v17 = vld [vmem:[%s2941_s16 + $0xa8] ss:$16 sps:$4 sm:$0xff]  }
  0x5e   : > { %v2524_v34 = vld [vmem:[%s2941_s16 + $0x3e4] ss:$16 sps:$4 sm:$0xff]   ;;  %v2527_v36 = vld [vmem:[%s2941_s16 + $0x3e0] ss:$16 sps:$4 sm:$0xff]   ;;  %v2589_v18 = vld [vmem:[%s2941_s16 + $0x2a8] ss:$16 sps:$4 sm:$0xff]  }
  0x5f   : > { %1129 = vmatpush1.bf16.msra.mxu0 %v2502_v19  ;;  %v2528_v37 = vld [vmem:[%s2941_s16 + $0x1c4] ss:$16 sps:$4 sm:$0xff]   ;;  %v2532_v39 = vld [vmem:[%s2941_s16 + $0x1c0] ss:$16 sps:$4 sm:$0xff]   ;;  %v2594_v19 = vld [vmem:[%s2941_s16 + $0x8c] ss:$16 sps:$4 sm:$0xff]  }
  0x60   : > { %1170 = vmatpush1.bf16.msra.mxu1 %v2503_v20  ;;  %1130 = vmatprep.subr.bf16.mxu0 %v2504_v21  ;;  %v2530_v38 = vld [vmem:[%s2941_s16 + $0x3c4] ss:$16 sps:$4 sm:$0xff]   ;;  %v2533_v40 = vld [vmem:[%s2941_s16 + $0x3c0] ss:$16 sps:$4 sm:$0xff]   ;;  %v2597_v20 = vld [vmem:[%s2941_s16 + $0x28c] ss:$16 sps:$4 sm:$0xff]  }
  0x61   : > { %1171 = vmatprep.subr.bf16.mxu1 %v2506_v22  ;;  %v2534_v41 = vld [vmem:[%s2941_s16 + $0x1a4] ss:$16 sps:$4 sm:$0xff]   ;;  %v2538_v43 = vld [vmem:[%s2941_s16 + $0x1a0] ss:$16 sps:$4 sm:$0xff]   ;;  %v2592_v21 = vld [vmem:[%s2941_s16 + $0x88] ss:$16 sps:$4 sm:$0xff]  }
  0x62   : > { %v2536_v42 = vld [vmem:[%s2941_s16 + $0x3a4] ss:$16 sps:$4 sm:$0xff]   ;;  %v2539_v44 = vld [vmem:[%s2941_s16 + $0x3a0] ss:$16 sps:$4 sm:$0xff]   ;;  %v2595_v22 = vld [vmem:[%s2941_s16 + $0x288] ss:$16 sps:$4 sm:$0xff]  }
  0x63   : > { %1131 = vmatpush1.bf16.msra.mxu0 %v2508_v23  ;;  %v2540_v45 = vld [vmem:[%s2941_s16 + $0x184] ss:$16 sps:$4 sm:$0xff]   ;;  %v2544_v50 = vld [vmem:[%s2941_s16 + $0x180] ss:$16 sps:$4 sm:$0xff]   ;;  %v2600_v23 = vld [vmem:[%s2941_s16 + $0x6c] ss:$16 sps:$4 sm:$0xff]  }
  0x64   : > { %1172 = vmatpush1.bf16.msra.mxu1 %v2509_v24  ;;  %1132 = vmatprep.subr.bf16.mxu0 %v2510_v25  ;;  %v2542_v46 = vld [vmem:[%s2941_s16 + $0x384] ss:$16 sps:$4 sm:$0xff]   ;;  %v2545_v51 = vld [vmem:[%s2941_s16 + $0x380] ss:$16 sps:$4 sm:$0xff]   ;;  %v2603_v24 = vld [vmem:[%s2941_s16 + $0x26c] ss:$16 sps:$4 sm:$0xff]  }
  0x65   : > { %1173 = vmatprep.subr.bf16.mxu1 %v2512_v26  ;;  %v336_v47 = vld [vmem:[%s2955_s12] sm:$0xff]  ;;  %v2598_v25 = vld [vmem:[%s2941_s16 + $0x68] ss:$16 sps:$4 sm:$0xff]  }
  0x66   : > { %v3006_v48 = vcombine.high %v336_v47, %v336_v47  ;;  %v2546_v53 = vld [vmem:[%s2941_s16 + $0x164] ss:$16 sps:$4 sm:$0xff]   ;;  %v2550_v55 = vld [vmem:[%s2941_s16 + $0x160] ss:$16 sps:$4 sm:$0xff]   ;;  %v3030_v7 = vcombine.low %v336_v47, %v336_v47  ;;  %v2601_v26 = vld [vmem:[%s2941_s16 + $0x268] ss:$16 sps:$4 sm:$0xff]  }
  0x67   : > { %1133 = vmatpush1.bf16.msra.mxu0 %v2514_v27  ;;  %v2548_v54 = vld [vmem:[%s2941_s16 + $0x364] ss:$16 sps:$4 sm:$0xff]   ;;  %v2551_v56 = vld [vmem:[%s2941_s16 + $0x360] ss:$16 sps:$4 sm:$0xff]   ;;  %v2606_v27 = vld [vmem:[%s2941_s16 + $0x4c] ss:$16 sps:$4 sm:$0xff]  }
  0x68   : > { %1174 = vmatpush1.bf16.msra.mxu1 %v2515_v28  ;;  %1134 = vmatprep.subr.bf16.mxu0 %v2516_v29  ;;  %v2552_v57 = vld [vmem:[%s2941_s16 + $0x144] ss:$16 sps:$4 sm:$0xff]   ;;  %v2556_v59 = vld [vmem:[%s2941_s16 + $0x140] ss:$16 sps:$4 sm:$0xff]   ;;  %v2609_v28 = vld [vmem:[%s2941_s16 + $0x24c] ss:$16 sps:$4 sm:$0xff]  }
  0x69   : > { %1175 = vmatprep.subr.bf16.mxu1 %v2518_v30  ;;  %1152 = vmatprep.mubr.bf16.mxu0 %v3006_v48  ;;  %v2554_v58 = vld [vmem:[%s2941_s16 + $0x344] ss:$16 sps:$4 sm:$0xff]   ;;  %v2557_v60 = vld [vmem:[%s2941_s16 + $0x340] ss:$16 sps:$4 sm:$0xff]   ;;  %v2604_v29 = vld [vmem:[%s2941_s16 + $0x48] ss:$16 sps:$4 sm:$0xff]  }
  0x6a   : > { %v2558_v61 = vld [vmem:[%s2941_s16 + $0x124] ss:$16 sps:$4 sm:$0xff]   ;;  %v2562_v63 = vld [vmem:[%s2941_s16 + $0x120] ss:$16 sps:$4 sm:$0xff]   ;;  %v2607_v30 = vld [vmem:[%s2941_s16 + $0x248] ss:$16 sps:$4 sm:$0xff]  }
  0x6b   : > { %1135 = vmatpush1.bf16.msra.mxu0 %v2520_v31  ;;  %v2560_v62 = vld [vmem:[%s2941_s16 + $0x324] ss:$16 sps:$4 sm:$0xff]   ;;  %v2563_v0 = vld [vmem:[%s2941_s16 + $0x320] ss:$16 sps:$4 sm:$0xff]   ;;  %v2612_v31 = vld [vmem:[%s2941_s16 + $0x2c] ss:$16 sps:$4 sm:$0xff]  }
  0x6c   : > { %1176 = vmatpush1.bf16.msra.mxu1 %v2521_v32  ;;  %1136 = vmatprep.subr.bf16.mxu0 %v2522_v33  ;;  %v2564_v1 = vld [vmem:[%s2941_s16 + $0x104] ss:$16 sps:$4 sm:$0xff]   ;;  %v2568_v3 = vld [vmem:[%s2941_s16 + $0x100] ss:$16 sps:$4 sm:$0xff]   ;;  %v2615_v32 = vld [vmem:[%s2941_s16 + $0x22c] ss:$16 sps:$4 sm:$0xff]  }
  0x6d   : > { %1177 = vmatprep.subr.bf16.mxu1 %v2524_v34  ;;  %v2566_v2 = vld [vmem:[%s2941_s16 + $0x304] ss:$16 sps:$4 sm:$0xff]   ;;  %v2569_v4 = vld [vmem:[%s2941_s16 + $0x300] ss:$16 sps:$4 sm:$0xff]   ;;  %v2610_v33 = vld [vmem:[%s2941_s16 + $0x28] ss:$16 sps:$4 sm:$0xff]  }
  0x6e   : > { %v2613_v34 = vld [vmem:[%s2941_s16 + $0x228] ss:$16 sps:$4 sm:$0xff]   ;;  %v2636_v47 = vld [vmem:[%s2941_s16 + $0x1ac] ss:$16 sps:$4 sm:$0xff]  }
  0x6f   : > { %1137 = vmatpush2.bf16.msra.mxu0 %v2526_v35  ;;  %v2618_v35 = vld [vmem:[%s2941_s16 + $0xc] ss:$16 sps:$4 sm:$0xff]  }
  0x70   : > { %1178 = vmatpush2.bf16.msra.mxu1 %v2527_v36  ;;  %1138 = vmatprep.subr.bf16.mxu0 %v2528_v37  ;;  %v2621_v36 = vld [vmem:[%s2941_s16 + $0x20c] ss:$16 sps:$4 sm:$0xff]   ;;  %v2616_v37 = vld [vmem:[%s2941_s16 + $0x8] ss:$16 sps:$4 sm:$0xff]  }
  0x71   : > { %1179 = vmatprep.subr.bf16.mxu1 %v2530_v38  ;;  %v2619_v38 = vld [vmem:[%s2941_s16 + $0x208] ss:$16 sps:$4 sm:$0xff]  }
  0x73   : > { %1139 = vmatpush2.bf16.msra.mxu0 %v2532_v39  ;;  %v2624_v39 = vld [vmem:[%s2941_s16 + $0x1ec] ss:$16 sps:$4 sm:$0xff]  }
  0x74   : > { %1180 = vmatpush2.bf16.msra.mxu1 %v2533_v40  ;;  %1140 = vmatprep.subr.bf16.mxu0 %v2534_v41  ;;  %v2627_v40 = vld [vmem:[%s2941_s16 + $0x3ec] ss:$16 sps:$4 sm:$0xff]   ;;  %v2622_v41 = vld [vmem:[%s2941_s16 + $0x1e8] ss:$16 sps:$4 sm:$0xff]  }
  0x75   : > { %1181 = vmatprep.subr.bf16.mxu1 %v2536_v42  ;;  %v2625_v42 = vld [vmem:[%s2941_s16 + $0x3e8] ss:$16 sps:$4 sm:$0xff]  }
  0x77   : > { %1141 = vmatpush2.bf16.msra.mxu0 %v2538_v43  ;;  %v2630_v43 = vld [vmem:[%s2941_s16 + $0x1cc] ss:$16 sps:$4 sm:$0xff]  }
  0x78   : > { %1182 = vmatpush2.bf16.msra.mxu1 %v2539_v44  ;;  %1142 = vmatprep.subr.bf16.mxu0 %v2540_v45  ;;  %v2633_v44 = vld [vmem:[%s2941_s16 + $0x3cc] ss:$16 sps:$4 sm:$0xff]   ;;  %v2628_v45 = vld [vmem:[%s2941_s16 + $0x1c8] ss:$16 sps:$4 sm:$0xff]  }
  0x79   : > { %1183 = vmatprep.subr.bf16.mxu1 %v2542_v46  ;;  %v2631_v46 = vld [vmem:[%s2941_s16 + $0x3c8] ss:$16 sps:$4 sm:$0xff]  }
  0x7b   : > { %1143 = vmatpush2.bf16.msra.mxu0 %v2544_v50  ;;  %v2637_v50 = vld [vmem:[%s2941_s16 + $0x3a8] ss:$16 sps:$4 sm:$0xff]  }
  0x7c   : > { %1184 = vmatpush2.bf16.msra.mxu1 %v2545_v51  ;;  %1144 = vmatprep.subr.bf16.mxu0 %v2546_v53  ;;  %v2642_v51 = vld [vmem:[%s2941_s16 + $0x18c] ss:$16 sps:$4 sm:$0xff]   ;;  %v2640_v53 = vld [vmem:[%s2941_s16 + $0x188] ss:$16 sps:$4 sm:$0xff]  }
  0x7d   : > { %1185 = vmatprep.subr.bf16.mxu1 %v2548_v54  ;;  %v2643_v54 = vld [vmem:[%s2941_s16 + $0x388] ss:$16 sps:$4 sm:$0xff]  }
  0x7f   : > { %1145 = vmatpush2.bf16.msra.mxu0 %v2550_v55  ;;  %v2648_v55 = vld [vmem:[%s2941_s16 + $0x16c] ss:$16 sps:$4 sm:$0xff]  }
  0x80   : > { %1186 = vmatpush2.bf16.msra.mxu1 %v2551_v56  ;;  %1146 = vmatprep.subr.bf16.mxu0 %v2552_v57  ;;  %v2651_v56 = vld [vmem:[%s2941_s16 + $0x36c] ss:$16 sps:$4 sm:$0xff]   ;;  %v2646_v57 = vld [vmem:[%s2941_s16 + $0x168] ss:$16 sps:$4 sm:$0xff]  }
  0x81   : > { %1187 = vmatprep.subr.bf16.mxu1 %v2554_v58  ;;  %v2649_v58 = vld [vmem:[%s2941_s16 + $0x368] ss:$16 sps:$4 sm:$0xff]  }
  0x83   : > { %1147 = vmatpush2.bf16.msra.mxu0 %v2556_v59  ;;  %v2654_v59 = vld [vmem:[%s2941_s16 + $0x14c] ss:$16 sps:$4 sm:$0xff]  }
  0x84   : > { %1188 = vmatpush2.bf16.msra.mxu1 %v2557_v60  ;;  %1148 = vmatprep.subr.bf16.mxu0 %v2558_v61  ;;  %v2657_v60 = vld [vmem:[%s2941_s16 + $0x34c] ss:$16 sps:$4 sm:$0xff]   ;;  %v2652_v61 = vld [vmem:[%s2941_s16 + $0x148] ss:$16 sps:$4 sm:$0xff]  }
  0x85   : > { %1189 = vmatprep.subr.bf16.mxu1 %v2560_v62  ;;  %v2655_v62 = vld [vmem:[%s2941_s16 + $0x348] ss:$16 sps:$4 sm:$0xff]  }
  0x87   : > { %1149 = vmatpush2.bf16.msra.mxu0 %v2562_v63  ;;  %v2660_v63 = vld [vmem:[%s2941_s16 + $0x12c] ss:$16 sps:$4 sm:$0xff]  }
  0x88   : > { %1190 = vmatpush2.bf16.msra.mxu1 %v2563_v0  ;;  %1150 = vmatprep.subr.bf16.mxu0 %v2564_v1  ;;  %v2663_v0 = vld [vmem:[%s2941_s16 + $0x32c] ss:$16 sps:$4 sm:$0xff]   ;;  %v2658_v1 = vld [vmem:[%s2941_s16 + $0x128] ss:$16 sps:$4 sm:$0xff]  }
  0x89   : > { %1191 = vmatprep.subr.bf16.mxu1 %v2566_v2  ;;  %v2661_v2 = vld [vmem:[%s2941_s16 + $0x328] ss:$16 sps:$4 sm:$0xff]  }
  0x8b   : > { %1151 = vmatpush2.bf16.msra.mxu0 %v2568_v3  ;;  %v2666_v3 = vld [vmem:[%s2941_s16 + $0x10c] ss:$16 sps:$4 sm:$0xff]  }
  0x8c   : > { %1192 = vmatpush2.bf16.msra.mxu1 %v2569_v4  ;;  %1202 = vmatprep.subr.bf16.mxu0 %v2576_v5  ;;  %v2669_v4 = vld [vmem:[%s2941_s16 + $0x30c] ss:$16 sps:$4 sm:$0xff]   ;;  %v2664_v5 = vld [vmem:[%s2941_s16 + $0x108] ss:$16 sps:$4 sm:$0xff]  }
  0x8d   : > { %1243 = vmatprep.subr.bf16.mxu1 %v2579_v6  ;;  %v2667_v6 = vld [vmem:[%s2941_s16 + $0x308] ss:$16 sps:$4 sm:$0xff]  }
  0x8e   : > { %1153 = vmatmul.mubr.bf16.vlgmr.msra.gmra.mxu0 %v3030_v7 }
  0x8f   : > { %1194 = vmatmul.mubr.bf16.vlgmr.msra.gmra.mxu1 %v3032_v8  ;;  %1203 = vmatpush1.bf16.msra.mxu0 %v2574_v9 }
  0x90   : > { %1244 = vmatpush1.bf16.msra.mxu1 %v2577_v10  ;;  %1204 = vmatprep.subr.bf16.mxu0 %v2582_v11  ;;  %v332_v10 = vld [vmem:[#allocation2 + $0x10] sm:$0xff] }
  0x91   : > { %1245 = vmatprep.subr.bf16.mxu1 %v2585_v12  ;;  %1234 = vmatprep.mubr.bf16.mxu0 %v3006_v48  ;;  %v2639_v48 = vld [vmem:[%s2941_s16 + $0x3ac] ss:$16 sps:$4 sm:$0xff]  }
  0x92   : > { %1275 = vmatprep.mubr.bf16.mxu1 %v2205_v52  ;;  %v2645_v52 = vld [vmem:[%s2941_s16 + $0x38c] ss:$16 sps:$4 sm:$0xff]  }
  0x93   : > { %1205 = vmatpush1.bf16.msra.mxu0 %v2580_v13 }
  0x94   : > { %1246 = vmatpush1.bf16.msra.mxu1 %v2583_v14  ;;  %1206 = vmatprep.subr.bf16.mxu0 %v2588_v15  ;;  %v333_v14 = vld [vmem:[#allocation2] sm:$0xff] }
  0x95   : > { %1247 = vmatprep.subr.bf16.mxu1 %v2591_v16 }
  0x97   : > { %1207 = vmatpush1.bf16.msra.mxu0 %v2586_v17 }
  0x98   : > { %1248 = vmatpush1.bf16.msra.mxu1 %v2589_v18  ;;  %1208 = vmatprep.subr.bf16.mxu0 %v2594_v19 }
  0x99   : > { %1249 = vmatprep.subr.bf16.mxu1 %v2597_v20 }
  0x9b   : > { %1209 = vmatpush1.bf16.msra.mxu0 %v2592_v21 }
  0x9c   : > { %1250 = vmatpush1.bf16.msra.mxu1 %v2595_v22  ;;  %1210 = vmatprep.subr.bf16.mxu0 %v2600_v23 }
  0x9d   : > { %1251 = vmatprep.subr.bf16.mxu1 %v2603_v24 }
  0x9f   : > { %1211 = vmatpush1.bf16.msra.mxu0 %v2598_v25 }
  0xa0   : > { %1252 = vmatpush1.bf16.msra.mxu1 %v2601_v26  ;;  %1212 = vmatprep.subr.bf16.mxu0 %v2606_v27  ;;  %v335_v26 = vld [vmem:[#allocation2 + $0x8] sm:$0xff] }
  0xa1   : > { %1253 = vmatprep.subr.bf16.mxu1 %v2609_v28 }
  0xa3   : > { %1213 = vmatpush1.bf16.msra.mxu0 %v2604_v29 }
  0xa4   : > { %1254 = vmatpush1.bf16.msra.mxu1 %v2607_v30  ;;  %1214 = vmatprep.subr.bf16.mxu0 %v2612_v31 }
  0xa5   : > { %1255 = vmatprep.subr.bf16.mxu1 %v2615_v32 }
  0xa7   : > { %1215 = vmatpush1.bf16.msra.mxu0 %v2610_v33 }
  0xa8   : > { %1256 = vmatpush1.bf16.msra.mxu1 %v2613_v34  ;;  %1216 = vmatprep.subr.bf16.mxu0 %v2618_v35 }
  0xa9   : > { %1257 = vmatprep.subr.bf16.mxu1 %v2621_v36 }
  0xab   : > { %1217 = vmatpush1.bf16.msra.mxu0 %v2616_v37 }
  0xac   : > { %1258 = vmatpush1.bf16.msra.mxu1 %v2619_v38  ;;  %1218 = vmatprep.subr.bf16.mxu0 %v2624_v39 }
  0xad   : > { %1259 = vmatprep.subr.bf16.mxu1 %v2627_v40 }
  0xaf   : > { %1219 = vmatpush2.bf16.msra.mxu0 %v2622_v41 }
  0xb0   : > { %1260 = vmatpush2.bf16.msra.mxu1 %v2625_v42  ;;  %1220 = vmatprep.subr.bf16.mxu0 %v2630_v43 }
  0xb1   : > { %1261 = vmatprep.subr.bf16.mxu1 %v2633_v44 }
  0xb3   : > { %1221 = vmatpush2.bf16.msra.mxu0 %v2628_v45 }
  0xb4   : > { %1262 = vmatpush2.bf16.msra.mxu1 %v2631_v46  ;;  %1222 = vmatprep.subr.bf16.mxu0 %v2636_v47 }
  0xb5   : > { %1263 = vmatprep.subr.bf16.mxu1 %v2639_v48 }
  0xb7   : > { %1223 = vmatpush2.bf16.msra.mxu0 %v2634_v49 }
  0xb8   : > { %1264 = vmatpush2.bf16.msra.mxu1 %v2637_v50  ;;  %1224 = vmatprep.subr.bf16.mxu0 %v2642_v51 }
  0xb9   : > { %1265 = vmatprep.subr.bf16.mxu1 %v2645_v52 }
  0xbb   : > { %1225 = vmatpush2.bf16.msra.mxu0 %v2640_v53 }
  0xbc   : > { %1266 = vmatpush2.bf16.msra.mxu1 %v2643_v54  ;;  %1226 = vmatprep.subr.bf16.mxu0 %v2648_v55 }
  0xbd   : > { %1267 = vmatprep.subr.bf16.mxu1 %v2651_v56 }
  0xbf   : > { %1227 = vmatpush2.bf16.msra.mxu0 %v2646_v57 }
  0xc0   : > { %1268 = vmatpush2.bf16.msra.mxu1 %v2649_v58  ;;  %1228 = vmatprep.subr.bf16.mxu0 %v2654_v59 }
  0xc1   : > { %1269 = vmatprep.subr.bf16.mxu1 %v2657_v60 }
  0xc3   : > { %1229 = vmatpush2.bf16.msra.mxu0 %v2652_v61 }
  0xc4   : > { %1270 = vmatpush2.bf16.msra.mxu1 %v2655_v62  ;;  %1230 = vmatprep.subr.bf16.mxu0 %v2660_v63 }
  0xc5   : > { %1271 = vmatprep.subr.bf16.mxu1 %v2663_v0 }
  0xc7   : > { %1231 = vmatpush2.bf16.msra.mxu0 %v2658_v1 }
  0xc8   : > { %1272 = vmatpush2.bf16.msra.mxu1 %v2661_v2  ;;  %1232 = vmatprep.subr.bf16.mxu0 %v2666_v3 }
  0xc9   : > { %1273 = vmatprep.subr.bf16.mxu1 %v2669_v4 }
  0xcb   : > { %1233 = vmatpush2.bf16.msra.mxu0 %v2664_v5 }
  0xcc   : > { %1274 = vmatpush2.bf16.msra.mxu1 %v2667_v6 }
  0xce   : > { %1235 = vmatmul.mubr.bf16.vlgmr.msra.gmra.mxu0 %v3030_v7  ;;  %v334_v7 = vld [vmem:[#allocation2 + $0x18] sm:$0xff] }
  0xcf   : > { %1276 = vmatmul.mubr.bf16.vlgmr.msra.gmra.mxu1 %v3032_v8 }
 0x14e   : > { %v1154_v9 = vpop.f32.mrf.mxu0 }
 0x14f   : > { %v1195_v11 = vpop.f32.mrf.mxu1 }
 0x150   : > { %v1196_v12 = vadd.f32 %v1195_v11, %v1154_v9  ;;  %v1156_v13 = vpop.f32.mrf.mxu0 }
 0x151   : > { %v1197_v15 = vpop.f32.mrf.mxu1 }
 0x152   : > { %v1284_v16 = vadd.f32 %v1196_v12, %v332_v10  ;;  %v1198_v17 = vadd.f32 %v1197_v15, %v1156_v13  ;;  %v1158_v18 = vpop.f32.mrf.mxu0 }
 0x153   : > { %v1199_v19 = vpop.f32.mrf.mxu1 }
 0x154   : > { %1288 = vst [vmem:[#allocation2 + $0x10] sm:$0xff] %v1284_v16  ;;  %v1285_v20 = vadd.f32 %v1198_v17, %v333_v14  ;;  %v1159_v21 = vpop.f32.mrf.mxu0 }
 0x155   : > { %v1200_v22 = vpop.f32.mrf.mxu1 }
 0x156   : > { %1289 = vst [vmem:[#allocation2] sm:$0xff] %v1285_v20 }
 0x18e   : > { %v1236_v23 = vpop.f32.mrf.mxu0 }
 0x18f   : > { %v1277_v24 = vpop.f32.mrf.mxu1 }
 0x190   : > { %v1278_v8 = vadd.f32 %v1277_v24, %v1236_v23  ;;  %v1238_v25 = vpop.f32.mrf.mxu0 }
 0x191   : > { %v1279_v27 = vpop.f32.mrf.mxu1 }
 0x192   : > { %v1286_v28 = vadd.f32 %v1278_v8, %v334_v7  ;;  %v1280_v29 = vadd.f32 %v1279_v27, %v1238_v25  ;;  %v1240_v30 = vpop.f32.mrf.mxu0  ;;  %1295 = sbr.rel (%p2334_p3) target bundleno = 942 (0x3ae), region = 64 }
 0x193   : > { %v1281_v31 = vpop.f32.mrf.mxu1 }
 0x194   : > { %1290 = vst [vmem:[#allocation2 + $0x18] sm:$0xff] %v1286_v28  ;;  %v1287_v32 = vadd.f32 %v1280_v29, %v335_v26  ;;  %v1241_v33 = vpop.f32.mrf.mxu0 }
 0x195   : > { %v1282_v34 = vpop.f32.mrf.mxu1 }
 0x196   : > { %1291 = vst [vmem:[#allocation2 + $0x8] sm:$0xff] %v1287_v32 }
 0x197   : > { %v1391_v35 = vld [vmem:[#allocation6 + $0x1e8] sm:$0xff]  ;;  %v1390_v37 = vld [vmem:[#allocation6 + $0x1e0] sm:$0xff]  ;;  %vm2107_vm0 = vcmask 39936  }
 0x198   : > { %v1519_v36 = vld [vmem:[#allocation6 + $0x5e8] sm:$0xff]  ;;  %1608 = vmatprep.subr.mxu0 %v1391_v35  ;;  %v1518_v38 = vld [vmem:[#allocation6 + $0x5e0] sm:$0xff] }
 0x199   : > { %1679 = vmatprep.subr.mxu1 %v1519_v36  ;;  %v1387_v39 = vld [vmem:[#allocation6 + $0x1c8] sm:$0xff]  ;;  %1609 = vmatpush1.msra.mxu0 %v1390_v37  ;;  %v1386_v41 = vld [vmem:[#allocation6 + $0x1c0] sm:$0xff] }
 0x19a   : > { %v1515_v40 = vld [vmem:[#allocation6 + $0x5c8] sm:$0xff]  ;;  %1680 = vmatpush1.msra.mxu1 %v1518_v38  ;;  %v1514_v42 = vld [vmem:[#allocation6 + $0x5c0] sm:$0xff]  ;;  %1610 = vmatprep.subr.mxu0 %v1387_v39 }
 0x19b   : > { %v1383_v43 = vld [vmem:[#allocation6 + $0x1a8] sm:$0xff]  ;;  %1681 = vmatprep.subr.mxu1 %v1515_v40  ;;  %v1382_v45 = vld [vmem:[#allocation6 + $0x1a0] sm:$0xff]  ;;  %1611 = vmatpush1.msra.mxu0 %v1386_v41 }
 0x19c   : > { %v1511_v44 = vld [vmem:[#allocation6 + $0x5a8] sm:$0xff]  ;;  %v1510_v46 = vld [vmem:[#allocation6 + $0x5a0] sm:$0xff]  ;;  %1682 = vmatpush1.msra.mxu1 %v1514_v42  ;;  %1612 = vmatprep.subr.mxu0 %v1383_v43 }
 0x19d   : > { %v1379_v47 = vld [vmem:[#allocation6 + $0x188] sm:$0xff]  ;;  %1683 = vmatprep.subr.mxu1 %v1511_v44  ;;  %v1378_v49 = vld [vmem:[#allocation6 + $0x180] sm:$0xff]  ;;  %1613 = vmatpush1.msra.mxu0 %v1382_v45 }
 0x19e   : > { %v1507_v48 = vld [vmem:[#allocation6 + $0x588] sm:$0xff]  ;;  %v1506_v50 = vld [vmem:[#allocation6 + $0x580] sm:$0xff]  ;;  %1684 = vmatpush1.msra.mxu1 %v1510_v46  ;;  %1614 = vmatprep.subr.mxu0 %v1379_v47 }
 0x19f   : > { %v1375_v51 = vld [vmem:[#allocation6 + $0x168] sm:$0xff]  ;;  %1685 = vmatprep.subr.mxu1 %v1507_v48  ;;  %v1374_v53 = vld [vmem:[#allocation6 + $0x160] sm:$0xff]  ;;  %1615 = vmatpush1.msra.mxu0 %v1378_v49 }
 0x1a0   : > { %v1503_v52 = vld [vmem:[#allocation6 + $0x568] sm:$0xff]  ;;  %v1502_v54 = vld [vmem:[#allocation6 + $0x560] sm:$0xff]  ;;  %1686 = vmatpush1.msra.mxu1 %v1506_v50  ;;  %1616 = vmatprep.subr.mxu0 %v1375_v51 }
 0x1a1   : > { %v1371_v55 = vld [vmem:[#allocation6 + $0x148] sm:$0xff]  ;;  %1687 = vmatprep.subr.mxu1 %v1503_v52  ;;  %v1370_v57 = vld [vmem:[#allocation6 + $0x140] sm:$0xff]  ;;  %1617 = vmatpush1.msra.mxu0 %v1374_v53 }
 0x1a2   : > { %v1499_v56 = vld [vmem:[#allocation6 + $0x548] sm:$0xff]  ;;  %v1498_v58 = vld [vmem:[#allocation6 + $0x540] sm:$0xff]  ;;  %1688 = vmatpush1.msra.mxu1 %v1502_v54  ;;  %1618 = vmatprep.subr.mxu0 %v1371_v55 }
 0x1a3   : > { %v1367_v59 = vld [vmem:[#allocation6 + $0x128] sm:$0xff]  ;;  %1689 = vmatprep.subr.mxu1 %v1499_v56  ;;  %v1366_v61 = vld [vmem:[#allocation6 + $0x120] sm:$0xff]  ;;  %1619 = vmatpush1.msra.mxu0 %v1370_v57  ;;  %v1302_v57 = vlaneseq }
 0x1a4   : > { %v1495_v60 = vld [vmem:[#allocation6 + $0x528] sm:$0xff]  ;;  %v1494_v62 = vld [vmem:[#allocation6 + $0x520] sm:$0xff]  ;;  %1690 = vmatpush1.msra.mxu1 %v1498_v58  ;;  %1620 = vmatprep.subr.mxu0 %v1367_v59 }
 0x1a5   : > { %v1363_v63 = vld [vmem:[#allocation6 + $0x108] sm:$0xff]  ;;  %1691 = vmatprep.subr.mxu1 %v1495_v60  ;;  %v1362_v1 = vld [vmem:[#allocation6 + $0x100] sm:$0xff]  ;;  %1621 = vmatpush1.msra.mxu0 %v1366_v61 }
 0x1a6   : > { %v1491_v0 = vld [vmem:[#allocation6 + $0x508] sm:$0xff]  ;;  %v1490_v2 = vld [vmem:[#allocation6 + $0x500] sm:$0xff]  ;;  %1692 = vmatpush1.msra.mxu1 %v1494_v62  ;;  %1622 = vmatprep.subr.mxu0 %v1363_v63 }
 0x1a7   : > { %v1359_v3 = vld [vmem:[#allocation6 + $0xe8] sm:$0xff]  ;;  %1693 = vmatprep.subr.mxu1 %v1491_v0  ;;  %v1358_v5 = vld [vmem:[#allocation6 + $0xe0] sm:$0xff]  ;;  %1623 = vmatpush1.msra.mxu0 %v1362_v1 }
 0x1a8   : > { %v1487_v4 = vld [vmem:[#allocation6 + $0x4e8] sm:$0xff]  ;;  %v1486_v6 = vld [vmem:[#allocation6 + $0x4e0] sm:$0xff]  ;;  %1694 = vmatpush1.msra.mxu1 %v1490_v2  ;;  %1624 = vmatprep.subr.mxu0 %v1359_v3  ;;  %v3102_v2 = vshrl.u32 %v1302_v57, 7  ;;  %v1393_v57 = vld [vmem:[#allocation6 + $0x1f8] sm:$0xff] }
 0x1a9   : > { %v1355_v9 = vld [vmem:[#allocation6 + $0xc8] sm:$0xff]  ;;  %1695 = vmatprep.subr.mxu1 %v1487_v4  ;;  %v1354_v11 = vld [vmem:[#allocation6 + $0xc0] sm:$0xff]  ;;  %1625 = vmatpush1.msra.mxu0 %v1358_v5 }
 0x1aa   : > { %v1483_v10 = vld [vmem:[#allocation6 + $0x4c8] sm:$0xff]  ;;  %v1482_v12 = vld [vmem:[#allocation6 + $0x4c0] sm:$0xff]  ;;  %1696 = vmatpush1.msra.mxu1 %v1486_v6  ;;  %1626 = vmatprep.subr.mxu0 %v1355_v9 }
 0x1ab   : > { %v1351_v13 = vld [vmem:[#allocation6 + $0xa8] sm:$0xff]  ;;  %1697 = vmatprep.subr.mxu1 %v1483_v10  ;;  %v1350_v15 = vld [vmem:[#allocation6 + $0xa0] sm:$0xff]  ;;  %1627 = vmatpush1.msra.mxu0 %v1354_v11 }
 0x1ac   : > { %v1479_v14 = vld [vmem:[#allocation6 + $0x4a8] sm:$0xff]  ;;  %v1478_v16 = vld [vmem:[#allocation6 + $0x4a0] sm:$0xff]  ;;  %1698 = vmatpush1.msra.mxu1 %v1482_v12  ;;  %1628 = vmatprep.subr.mxu0 %v1351_v13  ;;  %v1308_v13 = vsub.s32 1, %v3102_v2 }
 0x1ad   : > { %v1347_v17 = vld [vmem:[#allocation6 + $0x88] sm:$0xff]  ;;  %1699 = vmatprep.subr.mxu1 %v1479_v14  ;;  %v1346_v19 = vld [vmem:[#allocation6 + $0x80] sm:$0xff]  ;;  %1629 = vmatpush1.msra.mxu0 %v1350_v15 }
 0x1ae   : > { %v1475_v18 = vld [vmem:[#allocation6 + $0x488] sm:$0xff]  ;;  %v1474_v20 = vld [vmem:[#allocation6 + $0x480] sm:$0xff]  ;;  %1700 = vmatpush1.msra.mxu1 %v1478_v16  ;;  %1630 = vmatprep.subr.mxu0 %v1347_v17  ;;  %v1304_v17 = vsub.s32 0, %v3102_v2 }
 0x1af   : > { %v1343_v21 = vld [vmem:[#allocation6 + $0x68] sm:$0xff]  ;;  %1701 = vmatprep.subr.mxu1 %v1475_v18  ;;  %v1342_v23 = vld [vmem:[#allocation6 + $0x60] sm:$0xff]  ;;  %1631 = vmatpush1.msra.mxu0 %v1346_v19 }
 0x1b0   : > { %v1471_v22 = vld [vmem:[#allocation6 + $0x468] sm:$0xff]  ;;  %v1470_v7 = vld [vmem:[#allocation6 + $0x460] sm:$0xff]  ;;  %1702 = vmatpush1.msra.mxu1 %v1474_v20  ;;  %1632 = vmatprep.subr.mxu0 %v1343_v21  ;;  %v1316_v20 = vsub.s32 3, %v3102_v2 }
 0x1b1   : > { %v1339_v24 = vld [vmem:[#allocation6 + $0x48] sm:$0xff]  ;;  %1703 = vmatprep.subr.mxu1 %v1471_v22  ;;  %v1338_v25 = vld [vmem:[#allocation6 + $0x40] sm:$0xff]  ;;  %1633 = vmatpush1.msra.mxu0 %v1342_v23  ;;  %v1312_v23 = vsub.s32 2, %v3102_v2 }
 0x1b2   : > { %v1467_v8 = vld [vmem:[#allocation6 + $0x448] sm:$0xff]  ;;  %v1466_v26 = vld [vmem:[#allocation6 + $0x440] sm:$0xff]  ;;  %1704 = vmatpush1.msra.mxu1 %v1470_v7  ;;  %1634 = vmatprep.subr.mxu0 %v1339_v24 }
 0x1b3   : > { %v1335_v27 = vld [vmem:[#allocation6 + $0x28] sm:$0xff]  ;;  %1705 = vmatprep.subr.mxu1 %v1467_v8  ;;  %v1334_v29 = vld [vmem:[#allocation6 + $0x20] sm:$0xff]  ;;  %1635 = vmatpush1.msra.mxu0 %v1338_v25 }
 0x1b4   : > { %v1463_v28 = vld [vmem:[#allocation6 + $0x428] sm:$0xff]  ;;  %v1462_v30 = vld [vmem:[#allocation6 + $0x420] sm:$0xff]  ;;  %1706 = vmatpush1.msra.mxu1 %v1466_v26  ;;  %1636 = vmatprep.subr.mxu0 %v1335_v27 }
 0x1b5   : > { %v1331_v31 = vld [vmem:[#allocation6 + $0x8] sm:$0xff]  ;;  %1707 = vmatprep.subr.mxu1 %v1463_v28  ;;  %v1330_v33 = vld [vmem:[#allocation6] sm:$0xff]  ;;  %1637 = vmatpush1.msra.mxu0 %v1334_v29 }
 0x1b6   : > { %v1459_v32 = vld [vmem:[#allocation6 + $0x408] sm:$0xff]  ;;  %v1458_v34 = vld [vmem:[#allocation6 + $0x400] sm:$0xff]  ;;  %1708 = vmatpush1.msra.mxu1 %v1462_v30  ;;  %1638 = vmatprep.subr.mxu0 %v1331_v31  ;;  %v1296_v31 = vld [vmem:[#allocation2 + $0x10] sm:$0xff] }
 0x1b7   : > { %v1455_v35 = vld [vmem:[#allocation6 + $0x3e8] sm:$0xff]  ;;  %1709 = vmatprep.subr.mxu1 %v1459_v32  ;;  %v1454_v37 = vld [vmem:[#allocation6 + $0x3e0] sm:$0xff]  ;;  %1639 = vmatpush1.msra.mxu0 %v1330_v33 }
 0x1b8   : > { %v1583_v36 = vld [vmem:[#allocation6 + $0x7e8] sm:$0xff]  ;;  %v1582_v38 = vld [vmem:[#allocation6 + $0x7e0] sm:$0xff]  ;;  %1710 = vmatpush1.msra.mxu1 %v1458_v34  ;;  %1640 = vmatprep.subr.mxu0 %v1455_v35 }
 0x1b9   : > { %v1451_v39 = vld [vmem:[#allocation6 + $0x3c8] sm:$0xff]  ;;  %1711 = vmatprep.subr.mxu1 %v1583_v36  ;;  %v1450_v41 = vld [vmem:[#allocation6 + $0x3c0] sm:$0xff]  ;;  %1641 = vmatpush2.msra.mxu0 %v1454_v37 }
 0x1ba   : > { %v1579_v40 = vld [vmem:[#allocation6 + $0x7c8] sm:$0xff]  ;;  %v1578_v42 = vld [vmem:[#allocation6 + $0x7c0] sm:$0xff]  ;;  %1712 = vmatpush2.msra.mxu1 %v1582_v38  ;;  %1642 = vmatprep.subr.mxu0 %v1451_v39 }
 0x1bb   : > { %v1447_v43 = vld [vmem:[#allocation6 + $0x3a8] sm:$0xff]  ;;  %1713 = vmatprep.subr.mxu1 %v1579_v40  ;;  %v1446_v45 = vld [vmem:[#allocation6 + $0x3a0] sm:$0xff]  ;;  %1643 = vmatpush2.msra.mxu0 %v1450_v41  ;;  %v1298_v40 = vld [vmem:[#allocation2 + $0x18] sm:$0xff] }
 0x1bc   : > { %v1575_v44 = vld [vmem:[#allocation6 + $0x7a8] sm:$0xff]  ;;  %v1574_v46 = vld [vmem:[#allocation6 + $0x7a0] sm:$0xff]  ;;  %1714 = vmatpush2.msra.mxu1 %v1578_v42  ;;  %1644 = vmatprep.subr.mxu0 %v1447_v43 }
 0x1bd   : > { %v1443_v47 = vld [vmem:[#allocation6 + $0x388] sm:$0xff]  ;;  %1715 = vmatprep.subr.mxu1 %v1575_v44  ;;  %v1442_v49 = vld [vmem:[#allocation6 + $0x380] sm:$0xff]  ;;  %1645 = vmatpush2.msra.mxu0 %v1446_v45 }
 0x1be   : > { %v1571_v48 = vld [vmem:[#allocation6 + $0x788] sm:$0xff]  ;;  %v1570_v50 = vld [vmem:[#allocation6 + $0x780] sm:$0xff]  ;;  %1716 = vmatpush2.msra.mxu1 %v1574_v46  ;;  %1646 = vmatprep.subr.mxu0 %v1443_v47 }
 0x1bf   : > { %v1439_v51 = vld [vmem:[#allocation6 + $0x368] sm:$0xff]  ;;  %1717 = vmatprep.subr.mxu1 %v1571_v48  ;;  %v1438_v53 = vld [vmem:[#allocation6 + $0x360] sm:$0xff]  ;;  %1647 = vmatpush2.msra.mxu0 %v1442_v49 }
 0x1c0   : > { %v1567_v52 = vld [vmem:[#allocation6 + $0x768] sm:$0xff]  ;;  %v1566_v54 = vld [vmem:[#allocation6 + $0x760] sm:$0xff]  ;;  %1718 = vmatpush2.msra.mxu1 %v1570_v50  ;;  %1648 = vmatprep.subr.mxu0 %v1439_v51 }
 0x1c1   : > { %v1435_v55 = vld [vmem:[#allocation6 + $0x348] sm:$0xff]  ;;  %1719 = vmatprep.subr.mxu1 %v1567_v52  ;;  %v1434_v58 = vld [vmem:[#allocation6 + $0x340] sm:$0xff]  ;;  %1649 = vmatpush2.msra.mxu0 %v1438_v53 }
 0x1c2   : > { %v1563_v56 = vld [vmem:[#allocation6 + $0x748] sm:$0xff]  ;;  %v1562_v59 = vld [vmem:[#allocation6 + $0x740] sm:$0xff]  ;;  %1720 = vmatpush2.msra.mxu1 %v1566_v54  ;;  %1650 = vmatprep.subr.mxu0 %v1435_v55 }
 0x1c3   : > { %v1431_v60 = vld [vmem:[#allocation6 + $0x328] sm:$0xff]  ;;  %1721 = vmatprep.subr.mxu1 %v1563_v56  ;;  %v1430_v62 = vld [vmem:[#allocation6 + $0x320] sm:$0xff]  ;;  %1651 = vmatpush2.msra.mxu0 %v1434_v58 }
 0x1c4   : > { %v1559_v61 = vld [vmem:[#allocation6 + $0x728] sm:$0xff]  ;;  %v1558_v63 = vld [vmem:[#allocation6 + $0x720] sm:$0xff]  ;;  %1722 = vmatpush2.msra.mxu1 %v1562_v59  ;;  %1652 = vmatprep.subr.mxu0 %v1431_v60  ;;  %v1521_v59 = vld [vmem:[#allocation6 + $0x5f8] sm:$0xff] }
 0x1c5   : > { %v1427_v0 = vld [vmem:[#allocation6 + $0x308] sm:$0xff]  ;;  %1723 = vmatprep.subr.mxu1 %v1559_v61  ;;  %v1426_v3 = vld [vmem:[#allocation6 + $0x300] sm:$0xff]  ;;  %1653 = vmatpush2.msra.mxu0 %v1430_v62  ;;  %v1392_v60 = vld [vmem:[#allocation6 + $0x1f0] sm:$0xff] }
 0x1c6   : > { %v1555_v1 = vld [vmem:[#allocation6 + $0x708] sm:$0xff]  ;;  %v1554_v4 = vld [vmem:[#allocation6 + $0x700] sm:$0xff]  ;;  %1724 = vmatpush2.msra.mxu1 %v1558_v63  ;;  %1654 = vmatprep.subr.mxu0 %v1427_v0  ;;  %v1520_v61 = vld [vmem:[#allocation6 + $0x5f0] sm:$0xff] }
 0x1c7   : > { %v1423_v5 = vld [vmem:[#allocation6 + $0x2e8] sm:$0xff]  ;;  %1725 = vmatprep.subr.mxu1 %v1555_v1  ;;  %v1422_v9 = vld [vmem:[#allocation6 + $0x2e0] sm:$0xff]  ;;  %1655 = vmatpush2.msra.mxu0 %v1426_v3  ;;  %v1389_v62 = vld [vmem:[#allocation6 + $0x1d8] sm:$0xff] }
 0x1c8   : > { %v1551_v6 = vld [vmem:[#allocation6 + $0x6e8] sm:$0xff]  ;;  %v1550_v10 = vld [vmem:[#allocation6 + $0x6e0] sm:$0xff]  ;;  %1726 = vmatpush2.msra.mxu1 %v1554_v4  ;;  %1656 = vmatprep.subr.mxu0 %v1423_v5  ;;  %v1517_v63 = vld [vmem:[#allocation6 + $0x5d8] sm:$0xff] }
 0x1c9   : > { %v1419_v11 = vld [vmem:[#allocation6 + $0x2c8] sm:$0xff]  ;;  %1727 = vmatprep.subr.mxu1 %v1551_v6  ;;  %v1418_v14 = vld [vmem:[#allocation6 + $0x2c0] sm:$0xff]  ;;  %1657 = vmatpush2.msra.mxu0 %v1422_v9  ;;  %v1388_v0 = vld [vmem:[#allocation6 + $0x1d0] sm:$0xff] }
 0x1ca   : > { %v1547_v12 = vld [vmem:[#allocation6 + $0x6c8] sm:$0xff]  ;;  %v1546_v15 = vld [vmem:[#allocation6 + $0x6c0] sm:$0xff]  ;;  %1728 = vmatpush2.msra.mxu1 %v1550_v10  ;;  %1658 = vmatprep.subr.mxu0 %v1419_v11  ;;  %v1516_v1 = vld [vmem:[#allocation6 + $0x5d0] sm:$0xff] }
 0x1cb   : > { %v1300_v16 = vld [vmem:[%s3380_s2] sm:$0xf]  ;;  %v1415_v18 = vld [vmem:[#allocation6 + $0x2a8] sm:$0xff]  ;;  %1729 = vmatprep.subr.mxu1 %v1547_v12  ;;  %1659 = vmatpush2.msra.mxu0 %v1418_v14  ;;  %v1385_v3 = vld [vmem:[#allocation6 + $0x1b8] sm:$0xff] }
 0x1cc   : > { %v1543_v19 = vld [vmem:[#allocation6 + $0x6a8] sm:$0xff]  ;;  %v1414_v21 = vld [vmem:[#allocation6 + $0x2a0] sm:$0xff]  ;;  %1730 = vmatpush2.msra.mxu1 %v1546_v15  ;;  %v1309_v8 = vrot.slane %v1300_v16, %v1308_v13  ;;  %1660 = vmatprep.subr.mxu0 %v1415_v18  ;;  %v1305_v28 = vrot.slane %v1300_v16, %v1304_v17  ;;  %v1317_v32 = vrot.slane %v1300_v16, %v1316_v20  ;;  %v1513_v4 = vld [vmem:[#allocation6 + $0x5b8] sm:$0xff] }
 0x1cd   : > { %v1542_v22 = vld [vmem:[#allocation6 + $0x6a0] sm:$0xff]  ;;  %v1411_v7 = vld [vmem:[#allocation6 + $0x288] sm:$0xff]  ;;  %1731 = vmatprep.subr.mxu1 %v1543_v19  ;;  %1661 = vmatpush2.msra.mxu0 %v1414_v21  ;;  %v1313_v36 = vrot.slane %v1300_v16, %v1312_v23  ;;  %v1384_v5 = vld [vmem:[#allocation6 + $0x1b0] sm:$0xff] }
 0x1ce   : > { %v1539_v24 = vld [vmem:[#allocation6 + $0x688] sm:$0xff]  ;;  %v1410_v25 = vld [vmem:[#allocation6 + $0x280] sm:$0xff]  ;;  %1732 = vmatpush2.msra.mxu1 %v1542_v22  ;;  %1662 = vmatprep.subr.mxu0 %v1411_v7  ;;  %v3121_v43 = vadd.f32 %v1305_v28, %v1296_v31  ;;  %v1512_v6 = vld [vmem:[#allocation6 + $0x5b0] sm:$0xff] }
 0x1cf   : > { %v1538_v26 = vld [vmem:[#allocation6 + $0x680] sm:$0xff]  ;;  %v1407_v29 = vld [vmem:[#allocation6 + $0x268] sm:$0xff]  ;;  %1733 = vmatprep.subr.mxu1 %v1539_v24  ;;  %1663 = vmatpush2.msra.mxu0 %v1410_v25  ;;  %v3125_v49 = vadd.f32 %v1313_v36, %v1298_v40  ;;  %v1381_v9 = vld [vmem:[#allocation6 + $0x198] sm:$0xff] }
 0x1d0   : > { %v1297_v27 = vld [vmem:[#allocation2] sm:$0xff]  ;;  %v1535_v30 = vld [vmem:[#allocation6 + $0x668] sm:$0xff]  ;;  %1734 = vmatpush2.msra.mxu1 %v1538_v26  ;;  %1664 = vmatprep.subr.mxu0 %v1407_v29  ;;  %v1326_v54 = vmax.f32 %v3121_v43, 0.0  ;;  %v1509_v10 = vld [vmem:[#allocation6 + $0x598] sm:$0xff] }
 0x1d1   : > { %v1406_v33 = vld [vmem:[#allocation6 + $0x260] sm:$0xff]  ;;  %v1299_v35 = vld [vmem:[#allocation2 + $0x8] sm:$0xff]  ;;  %v3119_v39 = vadd.f32 %v1309_v8, %v1297_v27  ;;  %1735 = vmatprep.subr.mxu1 %v1535_v30  ;;  %v1328_v58 = vmax.f32 %v3125_v49, 0.0  ;;  %v1380_v11 = vld [vmem:[#allocation6 + $0x190] sm:$0xff] }
 0x1d2   : > { %v1534_v34 = vld [vmem:[#allocation6 + $0x660] sm:$0xff]  ;;  %v1403_v37 = vld [vmem:[#allocation6 + $0x248] sm:$0xff]  ;;  %1665 = vmatpush2.msra.mxu0 %v1406_v33  ;;  %v3123_v46 = vadd.f32 %v1317_v32, %v1299_v35  ;;  %v1508_v12 = vld [vmem:[#allocation6 + $0x590] sm:$0xff] }
 0x1d3   : > { %v1531_v38 = vld [vmem:[#allocation6 + $0x648] sm:$0xff]  ;;  %v1402_v41 = vld [vmem:[#allocation6 + $0x240] sm:$0xff]  ;;  %1736 = vmatpush2.msra.mxu1 %v1534_v34  ;;  %1666 = vmatprep.subr.mxu0 %v1403_v37  ;;  %v1327_v52 = vmax.f32 %v3119_v39, 0.0  ;;  %v1377_v14 = vld [vmem:[#allocation6 + $0x178] sm:$0xff] }
 0x1d4   : > { %v1530_v42 = vld [vmem:[#allocation6 + $0x640] sm:$0xff]  ;;  %v1399_v44 = vld [vmem:[#allocation6 + $0x228] sm:$0xff]  ;;  %1737 = vmatprep.subr.mxu1 %v1531_v38  ;;  %1667 = vmatpush2.msra.mxu0 %v1402_v41  ;;  %v1329_v56 = vmax.f32 %v3123_v46, 0.0  ;;  %v1505_v15 = vld [vmem:[#allocation6 + $0x578] sm:$0xff] }
 0x1d5   : > { %v1527_v45 = vld [vmem:[#allocation6 + $0x628] sm:$0xff]  ;;  %v1398_v47 = vld [vmem:[#allocation6 + $0x220] sm:$0xff]  ;;  %1738 = vmatpush2.msra.mxu1 %v1530_v42  ;;  %1668 = vmatprep.subr.mxu0 %v1399_v44  ;;  %v1376_v16 = vld [vmem:[#allocation6 + $0x170] sm:$0xff] }
 0x1d6   : > { %v1526_v48 = vld [vmem:[#allocation6 + $0x620] sm:$0xff]  ;;  %v1395_v50 = vld [vmem:[#allocation6 + $0x208] sm:$0xff]  ;;  %1739 = vmatprep.subr.mxu1 %v1527_v45  ;;  %1669 = vmatpush2.msra.mxu0 %v1398_v47  ;;  %v1504_v18 = vld [vmem:[#allocation6 + $0x570] sm:$0xff] }
 0x1d7   : > { %v1523_v51 = vld [vmem:[#allocation6 + $0x608] sm:$0xff]  ;;  %v1394_v53 = vld [vmem:[#allocation6 + $0x200] sm:$0xff]  ;;  %1740 = vmatpush2.msra.mxu1 %v1526_v48  ;;  %1670 = vmatprep.subr.mxu0 %v1395_v50  ;;  %v1373_v19 = vld [vmem:[#allocation6 + $0x158] sm:$0xff] }
 0x1d8   : > { %v1522_v55 = vld [vmem:[#allocation6 + $0x600] sm:$0xff]  ;;  %1741 = vmatprep.subr.mxu1 %v1523_v51  ;;  %1671 = vmatpush2.msra.mxu0 %v1394_v53  ;;  %v1501_v21 = vld [vmem:[#allocation6 + $0x558] sm:$0xff]  ;;  %v1372_v22 = vld [vmem:[#allocation6 + $0x150] sm:$0xff] }
 0x1d9   : > { %1672 = vmatprep.mubr.f32.mxu0 %v1327_v52  ;;  %1742 = vmatpush2.msra.mxu1 %v1522_v55  ;;  %v1500_v7 = vld [vmem:[#allocation6 + $0x550] sm:$0xff]  ;;  %v1369_v24 = vld [vmem:[#allocation6 + $0x138] sm:$0xff]  ;;  %v1909_v43 = vld [vmem:[%s3383_s5 + $0x68] sm:$0xff] }
 0x1da   : > { %1673 = vmatmul.mubr.f32.vlgmr.msra.gmra.mxu0 %v1326_v54  ;;  %1743 = vmatprep.mubr.f32.mxu1 %v1329_v56  ;;  %v1497_v8 = vld [vmem:[#allocation6 + $0x538] sm:$0xff]  ;;  %v1368_v25 = vld [vmem:[#allocation6 + $0x130] sm:$0xff]  ;;  %v1924_v49 = vld [vmem:[%s3383_s5 + $0xe0] sm:$0xff] }
 0x1db   : > { %1750 = vmatprep.subr.mxu0 %v1393_v57  ;;  %1821 = vmatprep.subr.mxu1 %v1521_v59  ;;  %v1496_v26 = vld [vmem:[#allocation6 + $0x530] sm:$0xff]  ;;  %v1365_v27 = vld [vmem:[#allocation6 + $0x118] sm:$0xff]  ;;  %v2335_v2 = vld [vmem:[%s3384_s6] ss:$0 sm:$0xff] }
 0x1dc   : > { %1744 = vmatmul.mubr.f32.vlgmr.msra.gmra.mxu1 %v1328_v58  ;;  %1751 = vmatpush1.msra.mxu0 %v1392_v60  ;;  %v1493_v28 = vld [vmem:[#allocation6 + $0x518] sm:$0xff]  ;;  %v1364_v29 = vld [vmem:[#allocation6 + $0x110] sm:$0xff] }
 0x1dd   : > { %1822 = vmatpush1.msra.mxu1 %v1520_v61  ;;  %1752 = vmatprep.subr.mxu0 %v1389_v62  ;;  %v1492_v30 = vld [vmem:[#allocation6 + $0x510] sm:$0xff]  ;;  %v1361_v31 = vld [vmem:[#allocation6 + $0xf8] sm:$0xff] }
 0x1de   : > { %1823 = vmatprep.subr.mxu1 %v1517_v63  ;;  %1753 = vmatpush1.msra.mxu0 %v1388_v0  ;;  %v1489_v32 = vld [vmem:[#allocation6 + $0x4f8] sm:$0xff]  ;;  %v1360_v33 = vld [vmem:[#allocation6 + $0xf0] sm:$0xff] }
 0x1df   : > { %1824 = vmatpush1.msra.mxu1 %v1516_v1  ;;  %1754 = vmatprep.subr.mxu0 %v1385_v3  ;;  %v1488_v34 = vld [vmem:[#allocation6 + $0x4f0] sm:$0xff]  ;;  %v1357_v35 = vld [vmem:[#allocation6 + $0xd8] sm:$0xff] }
 0x1e0   : > { %1825 = vmatprep.subr.mxu1 %v1513_v4  ;;  %1755 = vmatpush1.msra.mxu0 %v1384_v5  ;;  %v1485_v36 = vld [vmem:[#allocation6 + $0x4d8] sm:$0xff]  ;;  %v1356_v37 = vld [vmem:[#allocation6 + $0xd0] sm:$0xff] }
 0x1e1   : > { %1826 = vmatpush1.msra.mxu1 %v1512_v6  ;;  %1756 = vmatprep.subr.mxu0 %v1381_v9  ;;  %v1484_v38 = vld [vmem:[#allocation6 + $0x4d0] sm:$0xff]  ;;  %v1353_v40 = vld [vmem:[#allocation6 + $0xb8] sm:$0xff] }
 0x1e2   : > { %1827 = vmatprep.subr.mxu1 %v1509_v10  ;;  %1757 = vmatpush1.msra.mxu0 %v1380_v11  ;;  %v1481_v41 = vld [vmem:[#allocation6 + $0x4b8] sm:$0xff]  ;;  %v1352_v42 = vld [vmem:[#allocation6 + $0xb0] sm:$0xff] }
 0x1e3   : > { %1828 = vmatpush1.msra.mxu1 %v1508_v12  ;;  %1758 = vmatprep.subr.mxu0 %v1377_v14  ;;  %v1480_v44 = vld [vmem:[#allocation6 + $0x4b0] sm:$0xff]  ;;  %v1349_v45 = vld [vmem:[#allocation6 + $0x98] sm:$0xff] }
 0x1e4   : > { %1829 = vmatprep.subr.mxu1 %v1505_v15  ;;  %1759 = vmatpush1.msra.mxu0 %v1376_v16  ;;  %v1477_v47 = vld [vmem:[#allocation6 + $0x498] sm:$0xff]  ;;  %v1348_v48 = vld [vmem:[#allocation6 + $0x90] sm:$0xff] }
 0x1e5   : > { %1830 = vmatpush1.msra.mxu1 %v1504_v18  ;;  %1760 = vmatprep.subr.mxu0 %v1373_v19  ;;  %v1476_v50 = vld [vmem:[#allocation6 + $0x490] sm:$0xff]  ;;  %v1345_v51 = vld [vmem:[#allocation6 + $0x78] sm:$0xff] }
 0x1e6   : > { %1831 = vmatprep.subr.mxu1 %v1501_v21  ;;  %1761 = vmatpush1.msra.mxu0 %v1372_v22  ;;  %v1473_v53 = vld [vmem:[#allocation6 + $0x478] sm:$0xff]  ;;  %v1344_v55 = vld [vmem:[#allocation6 + $0x70] sm:$0xff] }
 0x1e7   : > { %1832 = vmatpush1.msra.mxu1 %v1500_v7  ;;  %1762 = vmatprep.subr.mxu0 %v1369_v24  ;;  %v1472_v57 = vld [vmem:[#allocation6 + $0x470] sm:$0xff]  ;;  %v1341_v59 = vld [vmem:[#allocation6 + $0x58] sm:$0xff] }
 0x1e8   : > { %1833 = vmatprep.subr.mxu1 %v1497_v8  ;;  %1763 = vmatpush1.msra.mxu0 %v1368_v25  ;;  %v1469_v60 = vld [vmem:[#allocation6 + $0x458] sm:$0xff]  ;;  %v1340_v61 = vld [vmem:[#allocation6 + $0x50] sm:$0xff] }
 0x1e9   : > { %1834 = vmatpush1.msra.mxu1 %v1496_v26  ;;  %1764 = vmatprep.subr.mxu0 %v1365_v27  ;;  %v1468_v62 = vld [vmem:[#allocation6 + $0x450] sm:$0xff]  ;;  %v1337_v63 = vld [vmem:[#allocation6 + $0x38] sm:$0xff] }
 0x1ea   : > { %1835 = vmatprep.subr.mxu1 %v1493_v28  ;;  %1765 = vmatpush1.msra.mxu0 %v1364_v29  ;;  %v1465_v0 = vld [vmem:[#allocation6 + $0x438] sm:$0xff]  ;;  %v1336_v1 = vld [vmem:[#allocation6 + $0x30] sm:$0xff] }
 0x1eb   : > { %1836 = vmatpush1.msra.mxu1 %v1492_v30  ;;  %1766 = vmatprep.subr.mxu0 %v1361_v31  ;;  %v1464_v3 = vld [vmem:[#allocation6 + $0x430] sm:$0xff]  ;;  %v1333_v4 = vld [vmem:[#allocation6 + $0x18] sm:$0xff] }
 0x1ec   : > { %1837 = vmatprep.subr.mxu1 %v1489_v32  ;;  %1767 = vmatpush1.msra.mxu0 %v1360_v33  ;;  %v1461_v5 = vld [vmem:[#allocation6 + $0x418] sm:$0xff]  ;;  %v1332_v6 = vld [vmem:[#allocation6 + $0x10] sm:$0xff] }
 0x1ed   : > { %1838 = vmatpush1.msra.mxu1 %v1488_v34  ;;  %1768 = vmatprep.subr.mxu0 %v1357_v35  ;;  %v1460_v9 = vld [vmem:[#allocation6 + $0x410] sm:$0xff]  ;;  %v1457_v10 = vld [vmem:[#allocation6 + $0x3f8] sm:$0xff] }
 0x1ee   : > { %1839 = vmatprep.subr.mxu1 %v1485_v36  ;;  %1769 = vmatpush1.msra.mxu0 %v1356_v37  ;;  %v1585_v11 = vld [vmem:[#allocation6 + $0x7f8] sm:$0xff]  ;;  %v1456_v12 = vld [vmem:[#allocation6 + $0x3f0] sm:$0xff] }
 0x1ef   : > { %1840 = vmatpush1.msra.mxu1 %v1484_v38  ;;  %1770 = vmatprep.subr.mxu0 %v1353_v40  ;;  %v1584_v14 = vld [vmem:[#allocation6 + $0x7f0] sm:$0xff]  ;;  %v1453_v15 = vld [vmem:[#allocation6 + $0x3d8] sm:$0xff] }
 0x1f0   : > { %1841 = vmatprep.subr.mxu1 %v1481_v41  ;;  %1771 = vmatpush1.msra.mxu0 %v1352_v42  ;;  %v1581_v16 = vld [vmem:[#allocation6 + $0x7d8] sm:$0xff]  ;;  %v1452_v18 = vld [vmem:[#allocation6 + $0x3d0] sm:$0xff] }
 0x1f1   : > { %1842 = vmatpush1.msra.mxu1 %v1480_v44  ;;  %1772 = vmatprep.subr.mxu0 %v1349_v45  ;;  %v1580_v19 = vld [vmem:[#allocation6 + $0x7d0] sm:$0xff]  ;;  %v1449_v21 = vld [vmem:[#allocation6 + $0x3b8] sm:$0xff] }
 0x1f2   : > { %1843 = vmatprep.subr.mxu1 %v1477_v47  ;;  %1773 = vmatpush1.msra.mxu0 %v1348_v48  ;;  %v1577_v22 = vld [vmem:[#allocation6 + $0x7b8] sm:$0xff]  ;;  %v1448_v7 = vld [vmem:[#allocation6 + $0x3b0] sm:$0xff] }
 0x1f3   : > { %1844 = vmatpush1.msra.mxu1 %v1476_v50  ;;  %1774 = vmatprep.subr.mxu0 %v1345_v51  ;;  %v1576_v24 = vld [vmem:[#allocation6 + $0x7b0] sm:$0xff]  ;;  %v1445_v8 = vld [vmem:[#allocation6 + $0x398] sm:$0xff] }
 0x1f4   : > { %1845 = vmatprep.subr.mxu1 %v1473_v53  ;;  %1775 = vmatpush1.msra.mxu0 %v1344_v55  ;;  %v1573_v25 = vld [vmem:[#allocation6 + $0x798] sm:$0xff]  ;;  %v1444_v26 = vld [vmem:[#allocation6 + $0x390] sm:$0xff] }
 0x1f5   : > { %1846 = vmatpush1.msra.mxu1 %v1472_v57  ;;  %1776 = vmatprep.subr.mxu0 %v1341_v59  ;;  %v1572_v27 = vld [vmem:[#allocation6 + $0x790] sm:$0xff]  ;;  %v1441_v28 = vld [vmem:[#allocation6 + $0x378] sm:$0xff] }
 0x1f6   : > { %1847 = vmatprep.subr.mxu1 %v1469_v60  ;;  %1777 = vmatpush1.msra.mxu0 %v1340_v61  ;;  %v1569_v29 = vld [vmem:[#allocation6 + $0x778] sm:$0xff]  ;;  %v1440_v30 = vld [vmem:[#allocation6 + $0x370] sm:$0xff] }
 0x1f7   : > { %1848 = vmatpush1.msra.mxu1 %v1468_v62  ;;  %1778 = vmatprep.subr.mxu0 %v1337_v63  ;;  %v1568_v31 = vld [vmem:[#allocation6 + $0x770] sm:$0xff]  ;;  %v1437_v32 = vld [vmem:[#allocation6 + $0x358] sm:$0xff] }
 0x1f8   : > { %1849 = vmatprep.subr.mxu1 %v1465_v0  ;;  %1779 = vmatpush1.msra.mxu0 %v1336_v1  ;;  %v1565_v33 = vld [vmem:[#allocation6 + $0x758] sm:$0xff]  ;;  %v1436_v34 = vld [vmem:[#allocation6 + $0x350] sm:$0xff] }
 0x1f9   : > { %1850 = vmatpush1.msra.mxu1 %v1464_v3  ;;  %1780 = vmatprep.subr.mxu0 %v1333_v4  ;;  %v1564_v35 = vld [vmem:[#allocation6 + $0x750] sm:$0xff]  ;;  %v1433_v36 = vld [vmem:[#allocation6 + $0x338] sm:$0xff] }
 0x1fa   : > { %1851 = vmatprep.subr.mxu1 %v1461_v5  ;;  %1781 = vmatpush1.msra.mxu0 %v1332_v6  ;;  %v1561_v37 = vld [vmem:[#allocation6 + $0x738] sm:$0xff]  ;;  %v1432_v38 = vld [vmem:[#allocation6 + $0x330] sm:$0xff] }
 0x1fb   : > { %1852 = vmatpush1.msra.mxu1 %v1460_v9  ;;  %1782 = vmatprep.subr.mxu0 %v1457_v10  ;;  %v1560_v40 = vld [vmem:[#allocation6 + $0x730] sm:$0xff]  ;;  %v1429_v41 = vld [vmem:[#allocation6 + $0x318] sm:$0xff] }
 0x1fc   : > { %1853 = vmatprep.subr.mxu1 %v1585_v11  ;;  %1783 = vmatpush2.msra.mxu0 %v1456_v12  ;;  %v1557_v42 = vld [vmem:[#allocation6 + $0x718] sm:$0xff]  ;;  %v1428_v44 = vld [vmem:[#allocation6 + $0x310] sm:$0xff] }
 0x1fd   : > { %1854 = vmatpush2.msra.mxu1 %v1584_v14  ;;  %1784 = vmatprep.subr.mxu0 %v1453_v15  ;;  %v1556_v45 = vld [vmem:[#allocation6 + $0x710] sm:$0xff]  ;;  %v1425_v47 = vld [vmem:[#allocation6 + $0x2f8] sm:$0xff] }
 0x1fe   : > { %1855 = vmatprep.subr.mxu1 %v1581_v16  ;;  %1785 = vmatpush2.msra.mxu0 %v1452_v18  ;;  %v1553_v48 = vld [vmem:[#allocation6 + $0x6f8] sm:$0xff]  ;;  %v1424_v50 = vld [vmem:[#allocation6 + $0x2f0] sm:$0xff] }
 0x1ff   : > { %1856 = vmatpush2.msra.mxu1 %v1580_v19  ;;  %1786 = vmatprep.subr.mxu0 %v1449_v21  ;;  %v1552_v51 = vld [vmem:[#allocation6 + $0x6f0] sm:$0xff]  ;;  %v1421_v53 = vld [vmem:[#allocation6 + $0x2d8] sm:$0xff] }
 0x200   : > { %1857 = vmatprep.subr.mxu1 %v1577_v22  ;;  %1787 = vmatpush2.msra.mxu0 %v1448_v7  ;;  %v1549_v55 = vld [vmem:[#allocation6 + $0x6d8] sm:$0xff]  ;;  %v1420_v57 = vld [vmem:[#allocation6 + $0x2d0] sm:$0xff] }
 0x201   : > { %1858 = vmatpush2.msra.mxu1 %v1576_v24  ;;  %1788 = vmatprep.subr.mxu0 %v1445_v8  ;;  %v1548_v59 = vld [vmem:[#allocation6 + $0x6d0] sm:$0xff]  ;;  %v1417_v60 = vld [vmem:[#allocation6 + $0x2b8] sm:$0xff] }
 0x202   : > { %1859 = vmatprep.subr.mxu1 %v1573_v25  ;;  %1789 = vmatpush2.msra.mxu0 %v1444_v26  ;;  %v1545_v61 = vld [vmem:[#allocation6 + $0x6b8] sm:$0xff]  ;;  %v1416_v62 = vld [vmem:[#allocation6 + $0x2b0] sm:$0xff] }
 0x203   : > { %1860 = vmatpush2.msra.mxu1 %v1572_v27  ;;  %1790 = vmatprep.subr.mxu0 %v1441_v28  ;;  %v1544_v63 = vld [vmem:[#allocation6 + $0x6b0] sm:$0xff]  ;;  %v1413_v0 = vld [vmem:[#allocation6 + $0x298] sm:$0xff] }
 0x204   : > { %1861 = vmatprep.subr.mxu1 %v1569_v29  ;;  %1791 = vmatpush2.msra.mxu0 %v1440_v30  ;;  %v1541_v1 = vld [vmem:[#allocation6 + $0x698] sm:$0xff]  ;;  %v1412_v3 = vld [vmem:[#allocation6 + $0x290] sm:$0xff] }
 0x205   : > { %1862 = vmatpush2.msra.mxu1 %v1568_v31  ;;  %1792 = vmatprep.subr.mxu0 %v1437_v32  ;;  %v1540_v4 = vld [vmem:[#allocation6 + $0x690] sm:$0xff]  ;;  %v1409_v5 = vld [vmem:[#allocation6 + $0x278] sm:$0xff] }
 0x206   : > { %1863 = vmatprep.subr.mxu1 %v1565_v33  ;;  %1793 = vmatpush2.msra.mxu0 %v1436_v34  ;;  %v1537_v6 = vld [vmem:[#allocation6 + $0x678] sm:$0xff]  ;;  %v1408_v9 = vld [vmem:[#allocation6 + $0x270] sm:$0xff]  ;;  %v1957_v33 = vld [vmem:[%s3383_s5 + $0x1e8] sm:$0xff] }
 0x207   : > { %1864 = vmatpush2.msra.mxu1 %v1564_v35  ;;  %1794 = vmatprep.subr.mxu0 %v1433_v36  ;;  %v1536_v10 = vld [vmem:[#allocation6 + $0x670] sm:$0xff]  ;;  %v1405_v11 = vld [vmem:[#allocation6 + $0x258] sm:$0xff]  ;;  %v1921_v34 = vld [vmem:[%s3383_s5 + $0xc8] sm:$0xff] }
 0x208   : > { %1865 = vmatprep.subr.mxu1 %v1561_v37  ;;  %1795 = vmatpush2.msra.mxu0 %v1432_v38  ;;  %v1533_v12 = vld [vmem:[#allocation6 + $0x658] sm:$0xff]  ;;  %v1404_v14 = vld [vmem:[#allocation6 + $0x250] sm:$0xff]  ;;  %v1941_v35 = vld [vmem:[%s3383_s5 + $0x168] sm:$0xff] }
 0x209   : > { %1866 = vmatpush2.msra.mxu1 %v1560_v40  ;;  %1796 = vmatprep.subr.mxu0 %v1429_v41  ;;  %v1532_v15 = vld [vmem:[#allocation6 + $0x650] sm:$0xff]  ;;  %v1401_v16 = vld [vmem:[#allocation6 + $0x238] sm:$0xff]  ;;  %v1905_v36 = vld [vmem:[%s3383_s5 + $0x48] sm:$0xff] }
 0x20a   : > { %1867 = vmatprep.subr.mxu1 %v1557_v42  ;;  %1797 = vmatpush2.msra.mxu0 %v1428_v44  ;;  %v1529_v18 = vld [vmem:[#allocation6 + $0x638] sm:$0xff]  ;;  %v1400_v19 = vld [vmem:[#allocation6 + $0x230] sm:$0xff]  ;;  %v1956_v37 = vld [vmem:[%s3383_s5 + $0x1e0] sm:$0xff] }
 0x20b   : > { %1868 = vmatpush2.msra.mxu1 %v1556_v45  ;;  %1798 = vmatprep.subr.mxu0 %v1425_v47  ;;  %v1528_v21 = vld [vmem:[#allocation6 + $0x630] sm:$0xff]  ;;  %v1397_v22 = vld [vmem:[#allocation6 + $0x218] sm:$0xff]  ;;  %v1920_v38 = vld [vmem:[%s3383_s5 + $0xc0] sm:$0xff] }
 0x20c   : > { %1869 = vmatprep.subr.mxu1 %v1553_v48  ;;  %1799 = vmatpush2.msra.mxu0 %v1424_v50  ;;  %v1525_v7 = vld [vmem:[#allocation6 + $0x618] sm:$0xff]  ;;  %v1396_v24 = vld [vmem:[#allocation6 + $0x210] sm:$0xff]  ;;  %v1940_v40 = vld [vmem:[%s3383_s5 + $0x160] sm:$0xff] }
 0x20d   : > { %1870 = vmatpush2.msra.mxu1 %v1552_v51  ;;  %1800 = vmatprep.subr.mxu0 %v1421_v53  ;;  %v1524_v8 = vld [vmem:[#allocation6 + $0x610] sm:$0xff]  ;;  %v1927_v25 = vld [vmem:[%s3383_s5 + $0xf8] sm:$0xff]  ;;  %v1904_v41 = vld [vmem:[%s3383_s5 + $0x40] sm:$0xff] }
 0x20e   : > { %1871 = vmatprep.subr.mxu1 %v1549_v55  ;;  %1801 = vmatpush2.msra.mxu0 %v1420_v57  ;;  %v1911_v26 = vld [vmem:[%s3383_s5 + $0x78] sm:$0xff]  ;;  %v1926_v39 = vld [vmem:[%s3383_s5 + $0xf0] sm:$0xff]  ;;  %v1953_v55 = vld [vmem:[%s3383_s5 + $0x1c8] sm:$0xff] }
 0x20f   : > { %1872 = vmatpush2.msra.mxu1 %v1548_v59  ;;  %1802 = vmatprep.subr.mxu0 %v1417_v60  ;;  %v1910_v46 = vld [vmem:[%s3383_s5 + $0x70] sm:$0xff]  ;;  %v1959_v27 = vld [vmem:[%s3383_s5 + $0x1f8] sm:$0xff]  ;;  %v1917_v57 = vld [vmem:[%s3383_s5 + $0xa8] sm:$0xff] }
 0x210   : > { %1873 = vmatprep.subr.mxu1 %v1545_v61  ;;  %1803 = vmatpush2.msra.mxu0 %v1416_v62  ;;  %v1943_v28 = vld [vmem:[%s3383_s5 + $0x178] sm:$0xff]  ;;  %v1958_v29 = vld [vmem:[%s3383_s5 + $0x1f0] sm:$0xff]  ;;  %v1937_v59 = vld [vmem:[%s3383_s5 + $0x148] sm:$0xff] }
 0x211   : > { %1874 = vmatpush2.msra.mxu1 %v1544_v63  ;;  %1804 = vmatprep.subr.mxu0 %v1413_v0  ;;  %v1922_v30 = vld [vmem:[%s3383_s5 + $0xd0] sm:$0xff]  ;;  %v1955_v42 = vld [vmem:[%s3383_s5 + $0x1d8] sm:$0xff]  ;;  %v1901_v60 = vld [vmem:[%s3383_s5 + $0x28] sm:$0xff] }
 0x212   : > { %1875 = vmatprep.subr.mxu1 %v1541_v1  ;;  %1805 = vmatpush2.msra.mxu0 %v1412_v3  ;;  %v1942_v31 = vld [vmem:[%s3383_s5 + $0x170] sm:$0xff]  ;;  %v1919_v44 = vld [vmem:[%s3383_s5 + $0xb8] sm:$0xff]  ;;  %v1952_v61 = vld [vmem:[%s3383_s5 + $0x1c0] sm:$0xff] }
 0x213   : > { %1876 = vmatpush2.msra.mxu1 %v1540_v4  ;;  %1806 = vmatprep.subr.mxu0 %v1409_v5  ;;  %v1906_v32 = vld [vmem:[%s3383_s5 + $0x50] sm:$0xff]  ;;  %v1939_v45 = vld [vmem:[%s3383_s5 + $0x158] sm:$0xff]  ;;  %v1916_v62 = vld [vmem:[%s3383_s5 + $0xa0] sm:$0xff] }
 0x214   : > { %1877 = vmatprep.subr.mxu1 %v1537_v6  ;;  %1807 = vmatpush2.msra.mxu0 %v1408_v9  ;;  %v1903_v47 = vld [vmem:[%s3383_s5 + $0x38] sm:$0xff]  ;;  %v1954_v48 = vld [vmem:[%s3383_s5 + $0x1d0] sm:$0xff]  ;;  %v1936_v63 = vld [vmem:[%s3383_s5 + $0x140] sm:$0xff] }
 0x215   : > { %1878 = vmatpush2.msra.mxu1 %v1536_v10  ;;  %1808 = vmatprep.subr.mxu0 %v1405_v11  ;;  %v1918_v50 = vld [vmem:[%s3383_s5 + $0xb0] sm:$0xff]  ;;  %v1900_v0 = vld [vmem:[%s3383_s5 + $0x20] sm:$0xff]  ;;  %v1951_v1 = vld [vmem:[%s3383_s5 + $0x1b8] sm:$0xff] }
 0x216   : > { %1879 = vmatprep.subr.mxu1 %v1533_v12  ;;  %1809 = vmatpush2.msra.mxu0 %v1404_v14  ;;  %v1938_v51 = vld [vmem:[%s3383_s5 + $0x150] sm:$0xff]  ;;  %v1915_v3 = vld [vmem:[%s3383_s5 + $0x98] sm:$0xff]  ;;  %v1949_v12 = vld [vmem:[%s3383_s5 + $0x1a8] sm:$0xff] }
 0x217   : > { %1880 = vmatpush2.msra.mxu1 %v1532_v15  ;;  %1810 = vmatprep.subr.mxu0 %v1401_v16  ;;  %v1902_v53 = vld [vmem:[%s3383_s5 + $0x30] sm:$0xff]  ;;  %v1935_v4 = vld [vmem:[%s3383_s5 + $0x138] sm:$0xff]  ;;  %v1913_v14 = vld [vmem:[%s3383_s5 + $0x88] sm:$0xff] }
 0x218   : > { %1881 = vmatprep.subr.mxu1 %v1529_v18  ;;  %1811 = vmatpush2.msra.mxu0 %v1400_v19  ;;  %v1899_v5 = vld [vmem:[%s3383_s5 + $0x18] sm:$0xff]  ;;  %v1950_v6 = vld [vmem:[%s3383_s5 + $0x1b0] sm:$0xff]  ;;  %v1933_v15 = vld [vmem:[%s3383_s5 + $0x128] sm:$0xff] }
 0x219   : > { %1882 = vmatpush2.msra.mxu1 %v1528_v21  ;;  %1812 = vmatprep.subr.mxu0 %v1397_v22  ;;  %v1914_v9 = vld [vmem:[%s3383_s5 + $0x90] sm:$0xff]  ;;  %v1897_v16 = vld [vmem:[%s3383_s5 + $0x8] sm:$0xff]  ;;  %v1912_v18 = vld [vmem:[%s3383_s5 + $0x80] sm:$0xff] }
 0x21a   : > { %1883 = vmatprep.subr.mxu1 %v1525_v7  ;;  %1813 = vmatpush2.msra.mxu0 %v1396_v24  ;;  %v1934_v10 = vld [vmem:[%s3383_s5 + $0x130] sm:$0xff]  ;;  %v1896_v19 = vld [vmem:[%s3383_s5] sm:$0xff]  ;;  %v1947_v7 = vld [vmem:[%s3383_s5 + $0x198] sm:$0xff] }
 0x21b   : > { %1814 = vmatprep.mubr.f32.mxu0 %v1327_v52  ;;  %1884 = vmatpush2.msra.mxu1 %v1524_v8  ;;  %v1925_v52 = vld [vmem:[%s3383_s5 + $0xe8] sm:$0xff]  ;;  %v1898_v11 = vld [vmem:[%s3383_s5 + $0x10] sm:$0xff]  ;;  %v1948_v21 = vld [vmem:[%s3383_s5 + $0x1a0] sm:$0xff] }
 0x21c   : > { %1885 = vmatprep.mubr.f32.mxu1 %v1329_v56  ;;  %1815 = vmatmul.mubr.f32.vlgmr.msra.gmra.mxu0 %v1326_v54  ;;  %v1908_v54 = vld [vmem:[%s3383_s5 + $0x60] sm:$0xff]  ;;  %v1923_v56 = vld [vmem:[%s3383_s5 + $0xd8] sm:$0xff]  ;;  %v1946_v8 = vld [vmem:[%s3383_s5 + $0x190] sm:$0xff] }
 0x21d   : > { %1886 = vmatmul.mubr.f32.vlgmr.msra.gmra.mxu1 %v1328_v58  ;;  %2342 = vmatprep.subr.mxu0 %v1927_v25  ;;  %v1907_v58 = vld [vmem:[%s3383_s5 + $0x58] sm:$0xff]  ;;  %v1932_v22 = vld [vmem:[%s3383_s5 + $0x120] sm:$0xff]  ;;  %v1930_v25 = vld [vmem:[%s3383_s5 + $0x110] sm:$0xff] }
 0x21e   : > { %2343 = vmatpush3.msra.mxu0 %v1911_v26  ;;  %2377 = vmatprep.subr.mxu1 %v1959_v27  ;;  %v1931_v24 = vld [vmem:[%s3383_s5 + $0x118] sm:$0xff]  ;;  %v1945_v26 = vld [vmem:[%s3383_s5 + $0x188] sm:$0xff] }
 0x21f   : > { %2344 = vmatprep.subr.mxu0 %v1926_v39  ;;  %2378 = vmatpush3.msra.mxu1 %v1943_v28  ;;  %v1929_v39 = vld [vmem:[%s3383_s5 + $0x108] sm:$0xff] }
 0x220   : > { %2345 = vmatpush3.msra.mxu0 %v1910_v46  ;;  %2379 = vmatprep.subr.mxu1 %v1958_v29  ;;  %v1944_v46 = vld [vmem:[%s3383_s5 + $0x180] sm:$0xff] }
 0x221   : > { %2346 = vmatprep.subr.mxu0 %v1925_v52  ;;  %2380 = vmatpush3.msra.mxu1 %v1942_v31  ;;  %v1928_v52 = vld [vmem:[%s3383_s5 + $0x100] sm:$0xff] }
 0x222   : > { %2347 = vmatpush3.msra.mxu0 %v1909_v43  ;;  %2381 = vmatprep.subr.mxu1 %v1957_v33  ;;  %v1586_v43 = vld [vmem:[%s3382_s4] sm:$0xf] }
 0x223   : > { %2348 = vmatprep.subr.mxu0 %v1924_v49  ;;  %2382 = vmatpush3.msra.mxu1 %v1941_v35  ;;  %v1591_v49 = vrot.slane %v1586_v43, %v1304_v17  ;;  %v1599_v35 = vrot.slane %v1586_v43, %v1312_v23  ;;  %v1603_v17 = vrot.slane %v1586_v43, %v1316_v20 }
 0x224   : > { %2349 = vmatpush3.msra.mxu0 %v1908_v54  ;;  %2383 = vmatprep.subr.mxu1 %v1956_v37  ;;  %v1595_v54 = vrot.slane %v1586_v43, %v1308_v13 }
 0x225   : > { %2350 = vmatprep.subr.mxu0 %v1923_v56  ;;  %2384 = vmatpush3.msra.mxu1 %v1940_v40 }
 0x226   : > { %2351 = vmatpush3.msra.mxu0 %v1907_v58  ;;  %2385 = vmatprep.subr.mxu1 %v1955_v42 }
 0x227   : > { %2352 = vmatprep.subr.mxu0 %v1922_v30  ;;  %2386 = vmatpush3.msra.mxu1 %v1939_v45 }
 0x228   : > { %2353 = vmatpush3.msra.mxu0 %v1906_v32  ;;  %2387 = vmatprep.subr.mxu1 %v1954_v48 }
 0x229   : > { %2354 = vmatprep.subr.mxu0 %v1921_v34  ;;  %2388 = vmatpush3.msra.mxu1 %v1938_v51 }
 0x22a   : > { %2355 = vmatpush3.msra.mxu0 %v1905_v36  ;;  %2389 = vmatprep.subr.mxu1 %v1953_v55 }
 0x22b   : > { %2356 = vmatprep.subr.mxu0 %v1920_v38  ;;  %2390 = vmatpush3.msra.mxu1 %v1937_v59 }
 0x22c   : > { %2357 = vmatpush3.msra.mxu0 %v1904_v41  ;;  %2391 = vmatprep.subr.mxu1 %v1952_v61 }
 0x22d   : > { %2358 = vmatprep.subr.mxu0 %v1919_v44  ;;  %2392 = vmatpush3.msra.mxu1 %v1936_v63 }
 0x22e   : > { %2359 = vmatpush3.msra.mxu0 %v1903_v47  ;;  %2393 = vmatprep.subr.mxu1 %v1951_v1 }
 0x22f   : > { %2360 = vmatprep.subr.mxu0 %v1918_v50  ;;  %2394 = vmatpush3.msra.mxu1 %v1935_v4 }
 0x230   : > { %2361 = vmatpush3.msra.mxu0 %v1902_v53  ;;  %2395 = vmatprep.subr.mxu1 %v1950_v6 }
 0x231   : > { %2362 = vmatprep.subr.mxu0 %v1917_v57  ;;  %2396 = vmatpush3.msra.mxu1 %v1934_v10 }
 0x232   : > { %2363 = vmatpush3.msra.mxu0 %v1901_v60  ;;  %2397 = vmatprep.subr.mxu1 %v1949_v12 }
 0x233   : > { %2364 = vmatprep.subr.mxu0 %v1916_v62  ;;  %2398 = vmatpush3.msra.mxu1 %v1933_v15 }
 0x234   : > { %2365 = vmatpush3.msra.mxu0 %v1900_v0  ;;  %2399 = vmatprep.subr.mxu1 %v1948_v21 }
 0x235   : > { %2366 = vmatprep.subr.mxu0 %v1915_v3  ;;  %2400 = vmatpush3.msra.mxu1 %v1932_v22 }
 0x236   : > { %2367 = vmatpush3.msra.mxu0 %v1899_v5  ;;  %2401 = vmatprep.subr.mxu1 %v1947_v7 }
 0x237   : > { %2368 = vmatprep.subr.mxu0 %v1914_v9  ;;  %2402 = vmatpush3.msra.mxu1 %v1931_v24 }
 0x238   : > { %2369 = vmatpush3.msra.mxu0 %v1898_v11  ;;  %2403 = vmatprep.subr.mxu1 %v1946_v8 }
 0x239   : > { %2370 = vmatprep.subr.mxu0 %v1913_v14  ;;  %2404 = vmatpush3.msra.mxu1 %v1930_v25 }
 0x23a   : > { %2371 = vmatpush3.msra.mxu0 %v1897_v16  ;;  %2405 = vmatprep.subr.mxu1 %v1945_v26 }
 0x23b   : > { %2372 = vmatprep.subr.mxu0 %v1912_v18  ;;  %2406 = vmatpush3.msra.mxu1 %v1929_v39 }
 0x23c   : > { %2373 = vmatpush3.msra.mxu0 %v1896_v19  ;;  %2407 = vmatprep.subr.mxu1 %v1944_v46 }
 0x23d   : > { %2408 = vmatpush3.msra.mxu1 %v1928_v52 }
 0x29a   : > { %v1674_v56 = vpop.f32.mrf.mxu0 }
 0x29b   : > { %v1675_v58 = vadd.f32 %v1674_v56, %v1591_v49 }
 0x29c   : > { %v1745_v27 = vpop.f32.mrf.mxu1  ;;  %v1676_v28 = vpop.f32.mrf.mxu0 }
 0x29d   : > { %v1677_v29 = vadd.f32 %v1676_v28, %v1595_v54  ;;  %v1746_v30 = vadd.f32 %v1745_v27, %v1675_v58 }
 0x29e   : > { %v1747_v31 = vpop.f32.mrf.mxu1 }
 0x29f   : > { %v1748_v32 = vadd.f32 %v1747_v31, %v1677_v29  ;;  %v1892_v34 = vmax.f32 %v1746_v30, 0.0 }
 0x2a1   : > { %v1893_v33 = vmax.f32 %v1748_v32, 0.0 }
 0x2a3   : > { %2031 = vmatprep.mubr.f32.mxu0 %v1893_v33 }
 0x2a4   : > { %2032 = vmatmul.mubr.f32.vlgmr.msra.gmra.mxu0 %v1892_v34 }
 0x2dc   : > { %v1816_v36 = vpop.f32.mrf.mxu0 }
 0x2dd   : > { %v1887_v13 = vpop.f32.mrf.mxu1  ;;  %v1817_v37 = vadd.f32 %v1816_v36, %v1599_v35 }
 0x2de   : > { %v1818_v38 = vpop.f32.mrf.mxu0 }
 0x2df   : > { %v1819_v40 = vadd.f32 %v1818_v38, %v1603_v17  ;;  %v1888_v41 = vadd.f32 %v1887_v13, %v1817_v37  ;;  %v1889_v42 = vpop.f32.mrf.mxu1 }
 0x2e1   : > { %v1890_v44 = vadd.f32 %v1889_v42, %v1819_v40  ;;  %v1894_v47 = vmax.f32 %v1888_v41, 0.0 }
 0x2e3   : > { %v1895_v45 = vmax.f32 %v1890_v44, 0.0 }
 0x2e5   : > { %2101 = vmatprep.mubr.f32.mxu1 %v1895_v45 }
 0x2e6   : > { %2102 = vmatmul.mubr.f32.vlgmr.msra.gmra.mxu1 %v1894_v47 }
 0x364   : > { %v2374_v48 = vpop.f32.mrf.mxu0 }
 0x366   : > { %v2375_v50 = vpop.f32.mrf.mxu0 }
 0x367   : > { %v2376_v51 = vadd.f32 %v2375_v50, %v2374_v48 }
 0x369   : > { %v2034_v53 = vadd.f32 %v2376_v51, %v2335_v2 }
 0x3a6   : > { %v2409_v20 = vpop.f32.mrf.mxu1 }
 0x3a8   : > { %v2410_v23 = vpop.f32.mrf.mxu1 }
 0x3a9   : > { %v2411_v55 = vadd.f32 %v2410_v23, %v2409_v20 }
 0x3ab   : > { %v2104_v57 = vadd.f32 %v2411_v55, %v2034_v53 }
 0x3ad   : > { %2108 = vst.msk [vmem:[#allocation8] sm:$0xff] %vm2107_vm0, %v2104_v57 }
 0x3ae PF: > { %p2433_p7 = scmp.eq.s32.totalorder %s2859_s28, 1  ;;  %s2799_s10 = smov [#allocation8]  }
 0x3af   : > { %s2116_s27 = sshll.u32 %s2799_s10, 4  ;;  %s2117_s27 = int_to_ptr.vmem [resolvable:$true] %s2116_s27 }
 0x3b0   : > { %s2724_s14 = scalar_lea.vmem %s2117_s27, 128  ;;  %p2731_p12 = scmp.lt.s32.totalorder %s2117_s27, %s2117_s27 }
 0x3b1   : > { %p2725_p9 = scmp.ne.s32.totalorder %s2117_s27, %s2724_s14  ;;  %p2732_p13 = scmp.lt.s32.totalorder %s2724_s14, %s2724_s14 }
 0x3b3   : > { %p2726_p10 = pnand %p2725_p9, %p2433_p7  ;;  %p2733_p2 = por %p2732_p13, %p2731_p12 }
 0x3b5   : > { %p2727_p11 = pneg %p2726_p10 }
 0x3b7   : > { %p2734_p0 = pnand %p2733_p2, %p2727_p11 }
 0x3b9   : > { %2737 = shalt.err (!%p2734_p0)
}
 0x3ba   : > { %2419 = dma.vmem_to_hbm [thread:$0]  (%p2433_p7), %s2117_s27, 128, %s3385_s7, [#allocation5]  }
 0x3bb   : > { %2773 = dma.done.wait (%p2433_p7), [#allocation5], 128  }
 0x3bc   : > { %2775 = vsyncadd (%p2433_p7), [#allocation5], 4294967168 }
 0x3bd PF: > { %p19_p1 = scmp.ge.s32.totalorder %s2885_s11, 4   ;;  %s3398_s24 = smov %s2782_s25 }
 0x3be   : > { %s3399_s25 = smov %s2786_s26  ;;  %s3400_s26 = smov %s2902_s19 }
 0x3bf   : > { %s3401_s27 = smov %s2885_s11  ;;  %21 = sbr.rel (!%p19_p1) target bundleno = 5 (0x5), region = 100 }
 0x3c4   :  { %2129 = vsyncpa [#allocation4], 1 }
 0x3c5   :  { %2131 = vsyncpa [#allocation4 + $0x1], 1 }
 0x3c6   :  { %2132 = vsyncpa [#allocation7], 1 }
 0x3c7   :  { %2133 = vsyncpa [#allocation5], 1 }
 0x3c8   :  { %2135 = vsyncpa [#allocation5 + $0x1], 1 }

</bundles_post_ra>
